<compile_context>
chip_gen: v6e
topology: v6e:2x2x1
jax: 0.10.0
libtpu: 0.0.40
codegen_flags: <defaults>
</compile_context>

<pallas_src>
import math
import functools

import jax
import jax.numpy as jnp
from jax import lax
from jax.experimental import pallas as pl
from jax.experimental.pallas import tpu as pltpu


# ----------------------------------------------------------------------------
# XPOS helpers (standard interleaved rotary, matching the torch XPOS module).
# Used by the plain-XLA pre-pass and by the reference.
# ----------------------------------------------------------------------------
def _xpos_tables(seq_len, head_dim, scale_base=512):
    half = head_dim // 2
    scale_vec = (jnp.arange(0, head_dim, 2, dtype=jnp.float32) + 0.4 * head_dim) / (
        1.4 * head_dim
    )  # (half,)
    pos = jnp.arange(seq_len, dtype=jnp.float32)
    scale = scale_vec[None, :] ** (pos[:, None] / scale_base)          # (S, half)
    inv_freq = 1.0 / (10000.0 ** (jnp.arange(half, dtype=jnp.float32) / half))
    sinusoid = pos[:, None] * inv_freq[None, :]                        # (S, half)
    sin, cos = jnp.sin(sinusoid), jnp.cos(sinusoid)
    dup = lambda t: jnp.repeat(t, 2, axis=1)                           # duplicate_interleave
    cos_q, sin_q = dup(cos * scale), dup(sin * scale)                  # Q: upscale
    cos_k, sin_k = dup(cos / scale), dup(sin / scale)                  # K: downscale
    return cos_q, sin_q, cos_k, sin_k


def _rotate_every_two(x):
    x1 = x[..., 0::2]
    x2 = x[..., 1::2]
    return jnp.stack([-x2, x1], axis=-1).reshape(x.shape)


# ----------------------------------------------------------------------------
# Pallas kernel.  Grid = (batch, pair) where pair walks the lower triangle of
# (qi, ki) tiles, ki ascending within each q row (diagonal tile last).
# ----------------------------------------------------------------------------
def retention_kernel(qmap_ref, kmap_ref,                 # scalar-prefetch (SMEM)
                     q_ref, k_ref, v_ref,                # bf16 tiles
                     out_ref,                            # f32 output tile
                     acc_sc,                             # f32 accumulator scratch
                     *, gamma, tile):
    p = pl.program_id(1)
    qi = qmap_ref[p]
    ki = kmap_ref[p]
    T = tile
    log_g = math.log(gamma)
    bf = jnp.bfloat16

    n_i = lax.broadcasted_iota(jnp.int32, (T, 1), 0)
    m_i = lax.broadcasted_iota(jnp.int32, (1, T), 1)
    n_loc = n_i.astype(jnp.float32)
    m_loc = m_i.astype(jnp.float32)

    @pl.when(ki == 0)
    def _init():
        acc_sc[...] = jnp.zeros_like(acc_sc)

    @pl.when(ki < qi)
    def _off_diagonal():
        # Strictly below the diagonal every element is causal; fold the rank-1
        # decay gamma^(n-m) into the matmul operands with a per-tile balanced
        # split so BOTH factors have positive exponents (<= gamma^0.5 < 1):
        # no overflow; underflow to 0 only where the true decay is ~0.
        base = (qi - ki).astype(jnp.float32) * float(T)        # >= T here
        half_off = (base - float(T - 1)) * 0.5                 # >= 0.5
        rowf = jnp.exp((n_loc + half_off) * log_g)                     # (T, 1)
        colf = jnp.exp((half_off + float(T - 1) - m_loc) * log_g)      # (1, T)
        qs = (q_ref[0] * rowf).astype(bf)                              # (T, head)
        ks = (k_ref[0] * colf).astype(bf)                              # (head, T)
        s = jnp.dot(qs, ks, preferred_element_type=jnp.float32)        # (T, T)
        acc_sc[...] += jnp.dot(s.astype(bf), v_ref[0],
                               preferred_element_type=jnp.float32)

    @pl.when(ki == qi)
    def _diagonal_and_store():
        # Diagonal tile: explicit masked decay.  Exponent argument clamped to
        # <= 0 so exp never overflows; anti-causal entries are zeroed.
        s = jnp.dot(q_ref[0], k_ref[0], preferred_element_type=jnp.float32)
        e = jnp.minimum((n_loc - m_loc) * log_g, 0.0)
        d = jnp.where(n_i >= m_i, jnp.exp(e), 0.0)
        acc_sc[...] += jnp.dot((s * d).astype(bf), v_ref[0],
                               preferred_element_type=jnp.float32)
        out_ref[0] = acc_sc[...].astype(out_ref.dtype)


# ----------------------------------------------------------------------------
# VMEM sizing (generation-aware).
# ----------------------------------------------------------------------------
def _vmem_bytes_estimate(T, head, v_pad):
    bf16, f32 = 2, 4
    streamed = 2 * (T * head * bf16 + head * T * bf16 + T * v_pad * bf16)  # double-buffered
    out_buf = 2 * T * v_pad * f32
    scratch = T * v_pad * f32
    temps = 3 * T * T * f32 + 4 * T * max(head, v_pad) * f32
    return streamed + out_buf + scratch + temps


def _vmem_limit_bytes(estimate):
    phys = 64 * 1024 * 1024
    try:
        info = pltpu.get_tpu_info()
        phys = int(getattr(info, "vmem_capacity_bytes", phys))
    except Exception:
        pass
    # ~48 MiB cap on 64 MiB parts (v7x headroom for compiler scratch),
    # up to ~96 MiB on 128 MiB parts (v5e/v6e).
    cap = 48 * 1024 * 1024 if phys <= 64 * 1024 * 1024 else 96 * 1024 * 1024
    return int(min(cap, max(16 * 1024 * 1024, 3 * estimate)))


# ----------------------------------------------------------------------------
# Wrapper: XLA pre-pass + triangular-schedule pallas_call.
# ----------------------------------------------------------------------------
def simple_retention(Query, Key, Value, W_Q, W_K, W_V, gamma, *, tile=512):
    B, S, H = Query.shape
    head = W_Q.shape[1]
    v_dim = W_V.shape[1]

    T = min(tile, S)
    assert S % T == 0, f"sequence length {S} must be divisible by tile {T}"
    num_t = S // T

    # Lane-dense output: pad v_dim up to a multiple of 128, slice back after.
    v_pad = ((v_dim + 127) // 128) * 128

    # ---- pre-pass (plain XLA): projections + xpos rotary, done once in f32 ----
    f32 = jnp.float32
    Q = jnp.einsum("bsh,hd->bsd", Query.astype(f32), W_Q.astype(f32))
    K = jnp.einsum("bsh,hd->bsd", Key.astype(f32), W_K.astype(f32))
    V = jnp.einsum("bsh,hd->bsd", Value.astype(f32), W_V.astype(f32))
    if v_pad != v_dim:
        V = jnp.pad(V, ((0, 0), (0, 0), (0, v_pad - v_dim)))

    cos_q, sin_q, cos_k, sin_k = _xpos_tables(S, head)
    Qr = Q * cos_q[None] + _rotate_every_two(Q) * sin_q[None]
    Kr = K * cos_k[None] + _rotate_every_two(K) * sin_k[None]

    bf = jnp.bfloat16
    Qr = Qr.astype(bf)                           # (B, S, head)
    Kr_t = jnp.swapaxes(Kr, 1, 2).astype(bf)     # (B, head, S)  pre-transposed
    Vb = V.astype(bf)                            # (B, S, v_pad)

    # ---- triangular (qi, ki) schedule: ki ascending, diagonal last per row ----
    pairs = [(q, k) for q in range(num_t) for k in range(q + 1)]
    qmap = jnp.asarray([q for q, _ in pairs], dtype=jnp.int32)
    kmap = jnp.asarray([k for _, k in pairs], dtype=jnp.int32)
    P = len(pairs)

    kernel = functools.partial(retention_kernel, gamma=float(gamma), tile=T)

    grid_spec = pltpu.PrefetchScalarGridSpec(
        num_scalar_prefetch=2,
        grid=(B, P),
        in_specs=[
            pl.BlockSpec((1, T, head), lambda b, p, qm, km: (b, qm[p], 0)),   # Qr
            pl.BlockSpec((1, head, T), lambda b, p, qm, km: (b, 0, km[p])),   # Kr^T
            pl.BlockSpec((1, T, v_pad), lambda b, p, qm, km: (b, km[p], 0)),  # V
        ],
        out_specs=pl.BlockSpec((1, T, v_pad), lambda b, p, qm, km: (b, qm[p], 0)),
        scratch_shapes=[pltpu.VMEM((T, v_pad), jnp.float32)],                 # accumulator
    )

    vmem_limit = _vmem_limit_bytes(_vmem_bytes_estimate(T, head, v_pad))

    out = pl.pallas_call(
        kernel,
        out_shape=jax.ShapeDtypeStruct((B, S, v_pad), jnp.float32),
        grid_spec=grid_spec,
        compiler_params=pltpu.CompilerParams(
            dimension_semantics=("parallel", "arbitrary"),
            vmem_limit_bytes=vmem_limit,
        ),
    )(qmap, kmap, Qr, Kr_t, Vb)

    return out[..., :v_dim] if v_pad != v_dim else out


# ----------------------------------------------------------------------------
# Pure-JAX f32 reference mirroring the PyTorch forward.
# ----------------------------------------------------------------------------
def reference(Query, Key, Value, W_Q, W_K, W_V, gamma):
    B, S, H = Query.shape
    head = W_Q.shape[1]
    cos_q, sin_q, cos_k, sin_k = _xpos_tables(S, head)

    Q = Query @ W_Q
    K = Key @ W_K
    V = Value @ W_V
    Q = Q * cos_q[None] + _rotate_every_two(Q) * sin_q[None]
    K = K * cos_k[None] + _rotate_every_two(K) * sin_k[None]

    n = jnp.arange(S)[:, None]
    m = jnp.arange(S)[None, :]
    D = jnp.where(n >= m, gamma ** (n - m).astype(jnp.float32), 0.0)
    ret = jnp.einsum("bqd,bkd->bqk", Q, K) * D[None]
    return jnp.einsum("bqk,bkv->bqv", ret, V)


if __name__ == "__main__":
    # Small shapes consistent with the module; tile=128 so the triangular
    # schedule and the off-diagonal (decay-folded) path are both exercised.
    B, S, H = 2, 256, 32
    head_size = 32
    double_v_dim = False
    v_dim = head_size * 2 if double_v_dim else head_size
    gamma = 0.9

    key = jax.random.PRNGKey(0)
    kq, kk, kv, kwq, kwk, kwv = jax.random.split(key, 6)

    Query = jax.random.normal(kq, (B, S, H), dtype=jnp.float32)
    Key = jax.random.normal(kk, (B, S, H), dtype=jnp.float32)
    Value = jax.random.normal(kv, (B, S, H), dtype=jnp.float32)

    # torch.randn(hidden, head) / hidden -> normal / H.
    W_Q = jax.random.normal(kwq, (H, head_size), dtype=jnp.float32) / H
    W_K = jax.random.normal(kwk, (H, head_size), dtype=jnp.float32) / H
    W_V = jax.random.normal(kwv, (H, v_dim), dtype=jnp.float32) / H

    out = simple_retention(Query, Key, Value, W_Q, W_K, W_V, gamma, tile=128)
    out = jax.block_until_ready(out)

    ref = reference(Query, Key, Value, W_Q, W_K, W_V, gamma)
    assert out.shape == (B, S, v_dim), out.shape
    max_err = float(jnp.max(jnp.abs(out - ref)))
    # bf16 MXU operands => relaxed tolerance vs the f32 reference (intentional).
    assert jnp.allclose(out, ref, atol=3e-2, rtol=3e-2), max_err
    print("KERNEL_OK")
</pallas_src>

<mosaic_0001>
module attributes {stable_mosaic.version = 11 : i64} {
  func.func @retention_kernel(%arg0: i32, %arg1: i32, %arg2: memref<3xi32, #tpu.memory_space<smem>>, %arg3: memref<3xi32, #tpu.memory_space<smem>>, %arg4: memref<1x128x32xbf16, #tpu.memory_space<vmem>>, %arg5: memref<1x32x128xbf16, #tpu.memory_space<vmem>>, %arg6: memref<1x128x128xbf16, #tpu.memory_space<vmem>>, %arg7: memref<1x128x128xf32, #tpu.memory_space<vmem>>, %arg8: memref<128x128xf32, #tpu.memory_space<vmem>>) attributes {dimension_semantics = [#tpu.dimension_semantics<parallel>, #tpu.dimension_semantics<arbitrary>], iteration_bounds = array<i64: 2, 3>, scalar_prefetch = 2 : i64, scratch_operands = 1 : i64, tpu.core_type = #tpu.core_type<tc>, window_params = [{transform_indices = @transform_0, window_bounds = array<i64: 1, 128, 32>}, {transform_indices = @transform_1, window_bounds = array<i64: 1, 32, 128>}, {transform_indices = @transform_2, window_bounds = array<i64: 1, 128, 128>}, {transform_indices = @transform_3, window_bounds = array<i64: 1, 128, 128>}]} {
    %0 = arith.index_cast %arg1 : i32 to index
    %1 = memref.load %arg2[%0] : memref<3xi32, #tpu.memory_space<smem>>
    %2 = arith.index_cast %arg1 : i32 to index
    %3 = memref.load %arg3[%2] : memref<3xi32, #tpu.memory_space<smem>>
    %4 = tpu.iota {dimensions = array<i32: 0>} : vector<128x1xi32>
    %5 = tpu.iota {dimensions = array<i32: 1>} : vector<1x128xi32>
    %6 = arith.sitofp %4 : vector<128x1xi32> to vector<128x1xf32>
    %7 = arith.sitofp %5 : vector<1x128xi32> to vector<1x128xf32>
    %c0_i32 = arith.constant 0 : i32
    %8 = arith.cmpi eq, %3, %c0_i32 : i32
    %9 = arith.extui %8 : i1 to i32
    %c0_i32_0 = arith.constant 0 : i32
    %10 = arith.cmpi ne, %9, %c0_i32_0 : i32
    scf.if %10 {
      %cst = arith.constant 0.000000e+00 : f32
      %17 = vector.broadcast %cst : f32 to vector<128x128xf32>
      %c0 = arith.constant 0 : index
      %c0_3 = arith.constant 0 : index
      %18 = vector.load %arg8[%c0, %c0_3] : memref<128x128xf32, #tpu.memory_space<vmem>>, vector<128x128xf32>
      tpu.vector_store %arg8[%c0, %c0_3], %17 {strides = array<i32>} : memref<128x128xf32, #tpu.memory_space<vmem>>, vector<128x128xf32>,
    } else {
    }
    %11 = arith.cmpi slt, %3, %1 : i32
    %12 = arith.extui %11 : i1 to i32
    %c0_i32_1 = arith.constant 0 : i32
    %13 = arith.cmpi ne, %12, %c0_i32_1 : i32
    scf.if %13 {
      %17 = arith.subi %1, %3 : i32
      %18 = arith.sitofp %17 : i32 to f32
      %cst = arith.constant 1.280000e+02 : f32
      %19 = arith.mulf %18, %cst : f32
      %cst_3 = arith.constant 1.270000e+02 : f32
      %20 = arith.subf %19, %cst_3 : f32
      %cst_4 = arith.constant 5.000000e-01 : f32
      %21 = arith.mulf %20, %cst_4 : f32
      %22 = vector.broadcast %21 : f32 to vector<128x1xf32>
      %23 = arith.addf %6, %22 : vector<128x1xf32>
      %cst_5 = arith.constant -0.105360515 : f32
      %24 = vector.broadcast %cst_5 : f32 to vector<128x1xf32>
      %25 = arith.mulf %23, %24 : vector<128x1xf32>
      %26 = math.exp %25 : vector<128x1xf32>
      %cst_6 = arith.constant 1.270000e+02 : f32
      %27 = arith.addf %21, %cst_6 : f32
      %28 = vector.broadcast %27 : f32 to vector<1x128xf32>
      %29 = arith.subf %28, %7 : vector<1x128xf32>
      %cst_7 = arith.constant -0.105360515 : f32
      %30 = vector.broadcast %cst_7 : f32 to vector<1x128xf32>
      %31 = arith.mulf %29, %30 : vector<1x128xf32>
      %32 = math.exp %31 : vector<1x128xf32>
      %c0 = arith.constant 0 : index
      %c0_8 = arith.constant 0 : index
      %c0_9 = arith.constant 0 : index
      %33 = vector.load %arg4[%c0, %c0_8, %c0_9] : memref<1x128x32xbf16, #tpu.memory_space<vmem>>, vector<1x128x32xbf16>
      %34 = vector.shape_cast %33 : vector<1x128x32xbf16> to vector<128x32xbf16>
      %35 = arith.extf %34 : vector<128x32xbf16> to vector<128x32xf32>
      %36 = vector.broadcast %26 : vector<128x1xf32> to vector<128x32xf32>
      %37 = arith.mulf %35, %36 : vector<128x32xf32>
      %38 = arith.truncf %37 : vector<128x32xf32> to vector<128x32xbf16>
      %c0_10 = arith.constant 0 : index
      %c0_11 = arith.constant 0 : index
      %c0_12 = arith.constant 0 : index
      %39 = vector.load %arg5[%c0_10, %c0_11, %c0_12] : memref<1x32x128xbf16, #tpu.memory_space<vmem>>, vector<1x32x128xbf16>
      %40 = vector.shape_cast %39 : vector<1x32x128xbf16> to vector<32x128xbf16>
      %41 = arith.extf %40 : vector<32x128xbf16> to vector<32x128xf32>
      %42 = vector.broadcast %32 : vector<1x128xf32> to vector<32x128xf32>
      %43 = arith.mulf %41, %42 : vector<32x128xf32>
      %44 = arith.truncf %43 : vector<32x128xf32> to vector<32x128xbf16>
      %cst_13 = arith.constant dense<0.000000e+00> : vector<128x128xf32>
      %45 = tpu.matmul %38, %44, %cst_13 {dimension_numbers = #tpu.dot_dimension_numbers<[1], [0], [0], [1], [0, 0, 1, 1], [], []>} : vector<128x32xbf16>, vector<32x128xbf16>, vector<128x128xf32> -> vector<128x128xf32>
      %c0_14 = arith.constant 0 : index
      %c0_15 = arith.constant 0 : index
      %46 = vector.load %arg8[%c0_14, %c0_15] : memref<128x128xf32, #tpu.memory_space<vmem>>, vector<128x128xf32>
      %47 = arith.truncf %45 : vector<128x128xf32> to vector<128x128xbf16>
      %c0_16 = arith.constant 0 : index
      %c0_17 = arith.constant 0 : index
      %c0_18 = arith.constant 0 : index
      %48 = vector.load %arg6[%c0_16, %c0_17, %c0_18] : memref<1x128x128xbf16, #tpu.memory_space<vmem>>, vector<1x128x128xbf16>
      %49 = vector.shape_cast %48 : vector<1x128x128xbf16> to vector<128x128xbf16>
      %cst_19 = arith.constant dense<0.000000e+00> : vector<128x128xf32>
      %50 = tpu.matmul %47, %49, %cst_19 {dimension_numbers = #tpu.dot_dimension_numbers<[1], [0], [0], [1], [0, 0, 1, 1], [], []>} : vector<128x128xbf16>, vector<128x128xbf16>, vector<128x128xf32> -> vector<128x128xf32>
      %51 = arith.addf %46, %50 : vector<128x128xf32>
      %c0_20 = arith.constant 0 : index
      %c0_21 = arith.constant 0 : index
      %52 = vector.load %arg8[%c0_20, %c0_21] : memref<128x128xf32, #tpu.memory_space<vmem>>, vector<128x128xf32>
      tpu.vector_store %arg8[%c0_20, %c0_21], %51 {strides = array<i32>} : memref<128x128xf32, #tpu.memory_space<vmem>>, vector<128x128xf32>,
    } else {
    }
    %14 = arith.cmpi eq, %3, %1 : i32
    %15 = arith.extui %14 : i1 to i32
    %c0_i32_2 = arith.constant 0 : i32
    %16 = arith.cmpi ne, %15, %c0_i32_2 : i32
    scf.if %16 {
      %c0 = arith.constant 0 : index
      %c0_3 = arith.constant 0 : index
      %c0_4 = arith.constant 0 : index
      %17 = vector.load %arg4[%c0, %c0_3, %c0_4] : memref<1x128x32xbf16, #tpu.memory_space<vmem>>, vector<1x128x32xbf16>
      %18 = vector.shape_cast %17 : vector<1x128x32xbf16> to vector<128x32xbf16>
      %c0_5 = arith.constant 0 : index
      %c0_6 = arith.constant 0 : index
      %c0_7 = arith.constant 0 : index
      %19 = vector.load %arg5[%c0_5, %c0_6, %c0_7] : memref<1x32x128xbf16, #tpu.memory_space<vmem>>, vector<1x32x128xbf16>
      %20 = vector.shape_cast %19 : vector<1x32x128xbf16> to vector<32x128xbf16>
      %cst = arith.constant dense<0.000000e+00> : vector<128x128xf32>
      %21 = tpu.matmul %18, %20, %cst {dimension_numbers = #tpu.dot_dimension_numbers<[1], [0], [0], [1], [0, 0, 1, 1], [], []>} : vector<128x32xbf16>, vector<32x128xbf16>, vector<128x128xf32> -> vector<128x128xf32>
      %22 = vector.broadcast %6 : vector<128x1xf32> to vector<128x128xf32>
      %23 = vector.broadcast %7 : vector<1x128xf32> to vector<128x128xf32>
      %24 = arith.subf %22, %23 : vector<128x128xf32>
      %cst_8 = arith.constant -0.105360515 : f32
      %25 = vector.broadcast %cst_8 : f32 to vector<128x128xf32>
      %26 = arith.mulf %24, %25 : vector<128x128xf32>
      %cst_9 = arith.constant 0.000000e+00 : f32
      %27 = vector.broadcast %cst_9 : f32 to vector<128x128xf32>
      %28 = arith.minimumf %26, %27 : vector<128x128xf32>
      %29 = vector.broadcast %4 : vector<128x1xi32> to vector<128x128xi32>
      %30 = vector.broadcast %5 : vector<1x128xi32> to vector<128x128xi32>
      %31 = arith.cmpi sge, %29, %30 : vector<128x128xi32>
      %32 = math.exp %28 : vector<128x128xf32>
      %cst_10 = arith.constant 0.000000e+00 : f32
      %33 = vector.broadcast %cst_10 : f32 to vector<128x128xf32>
      %34 = arith.select %31, %32, %33 : vector<128x128xi1>, vector<128x128xf32>
      %c0_11 = arith.constant 0 : index
      %c0_12 = arith.constant 0 : index
      %35 = vector.load %arg8[%c0_11, %c0_12] : memref<128x128xf32, #tpu.memory_space<vmem>>, vector<128x128xf32>
      %36 = arith.mulf %21, %34 : vector<128x128xf32>
      %37 = arith.truncf %36 : vector<128x128xf32> to vector<128x128xbf16>
      %c0_13 = arith.constant 0 : index
      %c0_14 = arith.constant 0 : index
      %c0_15 = arith.constant 0 : index
      %38 = vector.load %arg6[%c0_13, %c0_14, %c0_15] : memref<1x128x128xbf16, #tpu.memory_space<vmem>>, vector<1x128x128xbf16>
      %39 = vector.shape_cast %38 : vector<1x128x128xbf16> to vector<128x128xbf16>
      %cst_16 = arith.constant dense<0.000000e+00> : vector<128x128xf32>
      %40 = tpu.matmul %37, %39, %cst_16 {dimension_numbers = #tpu.dot_dimension_numbers<[1], [0], [0], [1], [0, 0, 1, 1], [], []>} : vector<128x128xbf16>, vector<128x128xbf16>, vector<128x128xf32> -> vector<128x128xf32>
      %41 = arith.addf %35, %40 : vector<128x128xf32>
      %c0_17 = arith.constant 0 : index
      %c0_18 = arith.constant 0 : index
      %42 = vector.load %arg8[%c0_17, %c0_18] : memref<128x128xf32, #tpu.memory_space<vmem>>, vector<128x128xf32>
      tpu.vector_store %arg8[%c0_17, %c0_18], %41 {strides = array<i32>} : memref<128x128xf32, #tpu.memory_space<vmem>>, vector<128x128xf32>,
      %c0_19 = arith.constant 0 : index
      %c0_20 = arith.constant 0 : index
      %43 = vector.load %arg8[%c0_19, %c0_20] : memref<128x128xf32, #tpu.memory_space<vmem>>, vector<128x128xf32>
      %c0_21 = arith.constant 0 : index
      %c0_22 = arith.constant 0 : index
      %c0_23 = arith.constant 0 : index
      %44 = vector.load %arg7[%c0_21, %c0_22, %c0_23] : memref<1x128x128xf32, #tpu.memory_space<vmem>>, vector<1x128x128xf32>
      %45 = vector.shape_cast %44 : vector<1x128x128xf32> to vector<128x128xf32>
      %46 = vector.shape_cast %43 : vector<128x128xf32> to vector<1x128x128xf32>
      tpu.vector_store %arg7[%c0_21, %c0_22, %c0_23], %46 {strides = array<i32>} : memref<1x128x128xf32, #tpu.memory_space<vmem>>, vector<1x128x128xf32>,
    } else {
    }
    return
  }
  func.func @transform_0(%arg0: i32, %arg1: i32, %arg2: memref<3xi32, #tpu.memory_space<smem>>, %arg3: memref<3xi32, #tpu.memory_space<smem>>) -> (i32, i32, i32) {
    %0 = arith.index_cast %arg1 : i32 to index
    %1 = memref.load %arg2[%0] : memref<3xi32, #tpu.memory_space<smem>>
    %c0_i32 = arith.constant 0 : i32
    %c0_i32_0 = arith.constant 0 : i32
    return %arg0, %1, %c0_i32 : i32, i32, i32
  }
  func.func @transform_1(%arg0: i32, %arg1: i32, %arg2: memref<3xi32, #tpu.memory_space<smem>>, %arg3: memref<3xi32, #tpu.memory_space<smem>>) -> (i32, i32, i32) {
    %0 = arith.index_cast %arg1 : i32 to index
    %1 = memref.load %arg3[%0] : memref<3xi32, #tpu.memory_space<smem>>
    %c0_i32 = arith.constant 0 : i32
    %c0_i32_0 = arith.constant 0 : i32
    return %arg0, %c0_i32, %1 : i32, i32, i32
  }
  func.func @transform_2(%arg0: i32, %arg1: i32, %arg2: memref<3xi32, #tpu.memory_space<smem>>, %arg3: memref<3xi32, #tpu.memory_space<smem>>) -> (i32, i32, i32) {
    %0 = arith.index_cast %arg1 : i32 to index
    %1 = memref.load %arg3[%0] : memref<3xi32, #tpu.memory_space<smem>>
    %c0_i32 = arith.constant 0 : i32
    %c0_i32_0 = arith.constant 0 : i32
    return %arg0, %1, %c0_i32 : i32, i32, i32
  }
  func.func @transform_3(%arg0: i32, %arg1: i32, %arg2: memref<3xi32, #tpu.memory_space<smem>>, %arg3: memref<3xi32, #tpu.memory_space<smem>>) -> (i32, i32, i32) {
    %0 = arith.index_cast %arg1 : i32 to index
    %1 = memref.load %arg2[%0] : memref<3xi32, #tpu.memory_space<smem>>
    %c0_i32 = arith.constant 0 : i32
    %c0_i32_0 = arith.constant 0 : i32
    return %arg0, %1, %c0_i32 : i32, i32, i32
  }
}

</mosaic_0001>

<bundles_post_ra>
// kernel: tpu_custom_call.1
= control target key start
LH: loop header
LB: loop body
LE: loop exit
PB: predicated region body
PF: predicated region fallthrough
CT: control target
= control target key end

     0   :  { %s2805_s0 = inlined_call_operand.vmem [shape: s32[3], index: 0, kind: input, shape index: {}]   ;;  %s2806_s2 = inlined_call_operand.vmem [shape: bf16[2,256,32], index: 2, kind: input, shape index: {}]   ;;  %s2807_s3 = inlined_call_operand.vmem [shape: bf16[2,32,256], index: 3, kind: input, shape index: {}]   ;;  %s2808_s4 = inlined_call_operand.vmem [shape: bf16[2,256,128], index: 4, kind: input, shape index: {}]   ;;  %s2809_s5 = inlined_call_operand.hbm [shape: f32[2,256,128], index: 5, kind: output, shape index: {}]   ;;  %s2810_s1 = inlined_call_operand.vmem [shape: s32[3], index: 1, kind: input, shape index: {}]  }
   0x1   :  { %2826 = sst [smem:[#allocation17_spill]] %s2807_s3  ;;  %s10_s20 = sshll.u32 %s2805_s0, 4  ;;  %s11_s20 = int_to_ptr.vmem [resolvable:$true] %s10_s20 }
   0x2   :  { %2827 = sst [smem:[#allocation18_spill]] %s2809_s5  ;;  %s14_s23 = sshll.u32 %s2810_s1, 4  ;;  %s15_s23 = int_to_ptr.vmem [resolvable:$true] %s14_s23 }
   0x3   :  { %s2098_s24 = scalar_lea.vmem %s11_s20, 16  ;;  %p2103_p1 = scmp.lt.s32.totalorder %s11_s20, %s11_s20 }
   0x4   :  { %p2099_p0 = scmp.ne.s32.totalorder %s11_s20, %s2098_s24  ;;  %p2104_p2 = scmp.lt.s32.totalorder %s2098_s24, %s2098_s24 }
   0x6   :  { %p2105_p3 = por %p2104_p2, %p2103_p1 }
   0x8   :  { %p2106_p4 = pnand %p2105_p3, %p2099_p0 }
   0xa   :  { %2109 = shalt.err (!%p2106_p4)  }
   0xb   :  { %s2234_s25 = smov [#allocation4]   ;;  %s2110_s26 = scalar_lea.vmem %s15_s23, 16 }
   0xc   :  { %13 = dma.vmem_to_smem %s11_s20, 16, %s2234_s25, [#allocation3] }
   0xd   :  { %p2111_p5 = scmp.ne.s32.totalorder %s15_s23, %s2110_s26  ;;  %p2115_p6 = scmp.lt.s32.totalorder %s15_s23, %s15_s23 }
   0xe   :  { %p2116_p7 = scmp.lt.s32.totalorder %s2110_s26, %s2110_s26 }
  0x10   :  { %p2117_p8 = por %p2116_p7, %p2115_p6 }
  0x12   :  { %p2118_p9 = pnand %p2117_p8, %p2111_p5 }
  0x14   :  { %2121 = shalt.err (!%p2118_p9)  }
  0x15   :  { %s2235_s0 = smov [#allocation5]  }
  0x16   :  { %17 = dma.vmem_to_smem %s15_s23, 16, %s2235_s0, [#allocation3] }
  0x17   :  { %2188 = dma.done.wait [#allocation3], 32 }
  0x18   :  { %2189 = vsyncadd [#allocation3], 4294967264 }
  0x19   :  { %19 = sfence }
  0x1a   :  { %20 = vsyncpa [#allocation8], 0 }
  0x1b   :  { %22 = vsyncpa [#allocation8 + $0x1], 0  ;;  %s2276_s1 = smov 0   ;;  %s2278_s27 = smov 0  }
  0x1c   :  { %s2280_s28 = smov 0   ;;  %s2282_s29 = smov 0  }
  0x1d   :  { %s2284_s30 = smov 0   ;;  %s2286_s6 = smov 0  }
  0x1e   :  { %s2288_s7 = smov 0   ;;  %s2290_s8 = smov 0  }
  0x1f   :  { %s2292_s9 = smov 0   ;;  %s2294_s10 = smov 0  }
  0x20 LB: > { %2828 = sst [smem:[#allocation12_spill]] %s2224_s8  ;;  %s1608_s11 = sadd.s32 4294967295, %s2232_s10   ;;  %s2232_s10 = sphi %s2294_s10, %s28_s10   ;;  %s2228_s9 = sphi %s2292_s9, %s2852_s9   ;;  %s2224_s8 = sphi %s2290_s8, %s2851_s8   ;;  %s2220_s7 = sphi %s2288_s7, %s2850_s7   ;;  %s2216_s6 = sphi %s2286_s6, %s2849_s6   ;;  %s2212_s30 = sphi %s2284_s30, %s2857_s30   ;;  %s2208_s29 = sphi %s2282_s29, %s2856_s29   ;;  %s2204_s28 = sphi %s2280_s28, %s2855_s28   ;;  %s2200_s27 = sphi %s2278_s27, %s2854_s27   ;;  %s2196_s1 = sphi %s2276_s1, %s2853_s1  }
  0x21   : > { %2829 = sst [smem:[#allocation13_spill]] %s2228_s9  ;;  %s1609_s12 = sadd.s32 4294967294, %s2232_s10  }
  0x22   : > { %s37_s13 = sadd.s32 1, %s2224_s8  ;;  %s40_s14 = sadd.s32 1, %s2228_s9 }
  0x23   : > { %p38_p10 = scmp.ge.s32.totalorder %s37_s13, 3  ;;  %s74_s15 = sld [smem:[#allocation5 + %s2224_s8]] }
  0x24   : > { %s81_s16 = sadd.s32 1, %s2212_s30  ;;  %p88_p11 = scmp.ne.s32.totalorder %s2212_s30, %s2208_s29 }
  0x25   : > { %s2859_s13 = smov (%p38_p10, %s37_s13), 0  ;;  %s2861_s14 = smov (!%p38_p10, %s40_s14), %s2228_s9 }
  0x26   : > { %2830 = sst [smem:[#allocation14_spill]] %s2859_s13  ;;  %p89_p12 = scmp.eq.s32.totalorder %s2232_s10, 0 }
  0x27   : > { %s75_s17 = sld [smem:[#allocation5 + %s2859_s13]]  ;;  %p42_p13 = scmp.ge.s32.totalorder %s2861_s14, 2 }
  0x28   : > { %s134_s18 = sld [smem:[#allocation4 + %s2224_s8]]  ;;  %p2340_p0 = por %p89_p12, %p88_p11 }
  0x29   : > { %s135_s20 = sld [smem:[#allocation4 + %s2859_s13]]  ;;  %s2863_s14 = smov (%p42_p13, %s2861_s14), 0 }
  0x2a   : > { %2832 = sst [smem:[#allocation15_spill]] %s2863_s14  ;;  %s141_s21 = sadd.s32 1, %s2204_s28 }
  0x2b   : > { %p151_p1 = scmp.ne.s32.totalorder %s2204_s28, %s2200_s27  ;;  %s76_s22 = ssub.s32 %s2228_s9, %s2863_s14 }
  0x2c   : > { %p152_p2 = scmp.eq.s32.totalorder %s1608_s11, 5  ;;  %p157_p3 = scmp.ne.s32.totalorder %s2200_s27, %s2196_s1 }
  0x2d   : > { %s77_s23 = ssub.s32 %s74_s15, %s75_s17  ;;  %p158_p6 = scmp.eq.s32.totalorder %s1609_s12, 5 }
  0x2e   : > { %s78_s24 = sor.u32 %s77_s23, %s76_s22  ;;  %p2354_p4 = por %p152_p2, %p151_p1 }
  0x2f   : > { %p79_p5 = scmp.eq.s32.totalorder %s78_s24, 0  ;;  %s137_s26 = ssub.s32 %s134_s18, %s135_s20 }
  0x30   : > { %s138_s0 = sor.u32 %s137_s26, %s76_s22  ;;  %p2361_p8 = por %p158_p6, %p157_p3 }
  0x31   : > { %s2359_s13 = scalar_select %p79_p5, %s2212_s30, %s81_s16  }
  0x32   : > { %p139_p7 = scmp.eq.s32.totalorder %s138_s0, 0  ;;  %p1611_p9 = scmp.ge.s32.totalorder %s2232_s10, 6 }
  0x33   : > { %2834 = sst [smem:[#allocation16_spill]] %s2359_s13 }
  0x34   : > { %s2366_s14 = scalar_select %p139_p7, %s2204_s28, %s141_s21  }
  0x35   : > { %174 = sbr.rel (%p1611_p9) target bundleno = 70 (0x46), region = 16 }
  0x3a   : > { %192 = sbr.rel (!%p2340_p0) target bundleno = 70 (0x46), region = 24  ;;  %s197_s11 = sld [smem:[#allocation5 + %s2224_s8]] (%p2340_p0) }
  0x3b   : > { %s194_s12 = sand.u32 (%p2340_p0), 1, %s2212_s30   ;;  %s1613_s15 = sshll.u32 (%p2340_p0), %s2228_s9, 3 }
  0x3c   : > { %s1612_s16 = sshll.u32 (%p2340_p0), %s194_s12, 4  ;;  %s2836_s3 = sld [smem:[#allocation17_spill]] (%p2340_p0) }
  0x3d   : > { %s196_s23 = scalar_lea.vmem (%p2340_p0), [#allocation6], %s1612_s16 }
  0x40   : > { %s199_s17 = sadd.s32 %s1613_s15, %s197_s11 }
  0x41   : > { %s1614_s18 = sshll.u32 %s199_s17, 2 }
  0x42   : > { %s201_s21 = scalar_lea.vmem %s2836_s3, %s1614_s18 }
  0x43   : > { %v218_v0 = vld [vmem:[%s201_s21] sm:$0xf]  ;;  %v220_v1 = vld [vmem:[%s201_s21 + $0x8] sm:$0xf]  ;;  %v222_v2 = vld [vmem:[%s201_s21 + $0x10] sm:$0xf] }
  0x44   : > { %219 = vst [vmem:[%s196_s23] sm:$0xf] %v218_v0  ;;  %221 = vst [vmem:[%s196_s23 + $0x4] sm:$0xf] %v220_v1  ;;  %v224_v3 = vld [vmem:[%s201_s21 + $0x18] sm:$0xf] }
  0x45   : > { %223 = vst [vmem:[%s196_s23 + $0x8] sm:$0xf] %v222_v2  ;;  %225 = vst [vmem:[%s196_s23 + $0xc] sm:$0xf] %v224_v3 }
  0x46 PF: > { %p1615_p10 = scmp.ge.s32.totalorder %s2232_s10, 1  ;;  %p271_p11 = scmp.lt.s32.totalorder %s2232_s10, 7 }
  0x48   : > { %p272_p12 = pnand %p1615_p10, %p271_p11 }
  0x49   : > { %s278_s19 = sand.u32 (!%p272_p12), 1, %s2208_s29   ;;  %s2814_s24 = sand.u32 (!%p272_p12), 1, %s2200_s27  }
  0x4a   : > { %275 = sbr.rel (%p272_p12) target bundleno = 1050 (0x41a), region = 69  ;;  %s2381_s26 = sshll.u32 (!%p272_p12), %s278_s19, 4 }
  0x4b   : > { %s2385_s0 = sshll.u32 (!%p272_p12), %s2814_s24, 7  ;;  %s2390_s11 = sld [smem:[#allocation4 + %s2216_s6]] (!%p272_p12) }
  0x4c   : > { %p323_p13 = scmp.lt.s32.totalorder (!%p272_p12), %s2220_s7, 1  ;;  %s2396_s12 = sld [smem:[#allocation5 + %s2216_s6]] (!%p272_p12) }
  0x4d   : > { %s2426_s15 = sld [smem:[#allocation4 + %s2216_s6]] (!%p272_p12)  ;;  %s2485_s8 = scalar_lea.vmem (!%p272_p12), [#allocation6], %s2381_s26 }
  0x4e   : > { %s2441_s16 = sld [smem:[#allocation5 + %s2216_s6]] (!%p272_p12)  ;;  %s2488_s13 = scalar_lea.vmem (!%p272_p12), [#allocation7], %s2385_s0 }
  0x4f   : > { %v351_v4 = vlaneseq  ;;  %s2411_s29 = scalar_select %p323_p13, %s2220_s7, 1 }
  0x51   : > { %v2387_v5 = vshrl.u32 %v351_v4, 7  ;;  %v2393_v6 = vand.u32 127, %v351_v4  ;;  %s1618_s17 = sshll.u32 %s2390_s11, 4  ;;  %s1619_s20 = sshll.u32 %s2411_s29, 5 }
  0x52   : > { %p325_p0 = scmp.lt.s32.totalorder %s1618_s17, 31  ;;  %s1621_s18 = sshll.u32 %s2396_s12, 4 }
  0x53   : > { %v2399_v7 = vadd.s32 8, %v2387_v5  ;;  %v2402_v8 = vadd.s32 16, %v2387_v5  ;;  %v2405_v9 = vadd.s32 24, %v2387_v5  ;;  %v2408_v10 = vadd.s32 32, %v2387_v5  ;;  %p338_p1 = scmp.lt.s32.totalorder %s1621_s18, 31 }
  0x54   : > { %v2414_v11 = vadd.s32 40, %v2387_v5  ;;  %v2417_v12 = vadd.s32 48, %v2387_v5  ;;  %v2420_v13 = vadd.s32 56, %v2387_v5  ;;  %v2423_v14 = vadd.s32 64, %v2387_v5  ;;  %s2865_s17 = smov (!%p325_p0, %s1618_s17), 31  ;;  %p1624_p2 = scmp.ne.s32.totalorder %s2441_s16, 0 }
  0x55   : > { %v2429_v15 = vadd.s32 72, %v2387_v5  ;;  %v2432_v16 = vadd.s32 80, %v2387_v5  ;;  %v2435_v17 = vadd.s32 88, %v2387_v5  ;;  %v2438_v18 = vadd.s32 96, %v2387_v5  ;;  %s2867_s18 = smov (!%p338_p1, %s1621_s18), 31  ;;  %s328_s22 = sadd.s32 %s1619_s20, %s2865_s17 }
  0x56   : > { %v2444_v19 = vadd.s32 104, %v2387_v5  ;;  %v2447_v20 = vadd.s32 112, %v2387_v5  ;;  %v2450_v21 = vadd.s32 120, %v2387_v5  ;;  %v370_v22 = vcvt.s32.f32 %v2387_v5  ;;  %s1620_s21 = sshll.u32 %s328_s22, 2  ;;  %s341_s23 = sadd.s32 %s1619_s20, %s2867_s18 }
  0x57   : > { %v371_v23 = vcvt.s32.f32 %v2399_v7  ;;  %v372_v24 = vcvt.s32.f32 %v2402_v8  ;;  %v373_v25 = vcvt.s32.f32 %v2405_v9  ;;  %v374_v26 = vcvt.s32.f32 %v2408_v10  ;;  %s2477_s12 = scalar_lea.vmem %s2806_s2, %s1620_s21  ;;  %s1623_s29 = sshll.u32 %s341_s23, 2 }
  0x58   : > { %v2824_v27 = vcvt.s32.f32 %v2414_v11  ;;  %v2823_v28 = vcvt.s32.f32 %v2417_v12  ;;  %v377_v29 = vcvt.s32.f32 %v2420_v13  ;;  %v2822_v30 = vcvt.s32.f32 %v2423_v14  ;;  %s2482_s9 = scalar_lea.vmem %s2808_s4, %s1623_s29  ;;  %390 = sbr.rel (%p1624_p2) target bundleno = 102 (0x66), region = 77 }
  0x59   : > { %v2820_v31 = vcvt.s32.f32 %v2429_v15  ;;  %v2819_v32 = vcvt.s32.f32 %v2432_v16  ;;  %v2821_v33 = vcvt.s32.f32 %v2435_v17  ;;  %v2818_v34 = vcvt.s32.f32 %v2438_v18 }
  0x5a   : > { %v2817_v35 = vcvt.s32.f32 %v2444_v19  ;;  %v2825_v36 = vcvt.s32.f32 %v2447_v20  ;;  %v385_v37 = vcvt.s32.f32 %v2450_v21  ;;  %v2472_v38 = vcvt.s32.f32 %v2393_v6 }
  0x5d   : > { %v2236_v39 = vmov 0.0  }
  0x5e   : > { %391 = vst [vmem:[#allocation2 + $0x30] sm:$0xff] %v2236_v39  ;;  %392 = vst [vmem:[#allocation2] sm:$0xff] %v2236_v39 }
  0x5f   : > { %393 = vst [vmem:[#allocation2 + $0x58] sm:$0xff] %v2236_v39  ;;  %394 = vst [vmem:[#allocation2 + $0x18] sm:$0xff] %v2236_v39 }
  0x60   : > { %395 = vst [vmem:[#allocation2 + $0x50] sm:$0xff] %v2236_v39  ;;  %396 = vst [vmem:[#allocation2 + $0x68] sm:$0xff] %v2236_v39 }
  0x61   : > { %397 = vst [vmem:[#allocation2 + $0x8] sm:$0xff] %v2236_v39  ;;  %398 = vst [vmem:[#allocation2 + $0x48] sm:$0xff] %v2236_v39 }
  0x62   : > { %399 = vst [vmem:[#allocation2 + $0x40] sm:$0xff] %v2236_v39  ;;  %400 = vst [vmem:[#allocation2 + $0x20] sm:$0xff] %v2236_v39 }
  0x63   : > { %401 = vst [vmem:[#allocation2 + $0x10] sm:$0xff] %v2236_v39  ;;  %402 = vst [vmem:[#allocation2 + $0x38] sm:$0xff] %v2236_v39 }
  0x64   : > { %403 = vst [vmem:[#allocation2 + $0x60] sm:$0xff] %v2236_v39  ;;  %404 = vst [vmem:[#allocation2 + $0x70] sm:$0xff] %v2236_v39 }
  0x65   : > { %405 = vst [vmem:[#allocation2 + $0x78] sm:$0xff] %v2236_v39  ;;  %406 = vst [vmem:[#allocation2 + $0x28] sm:$0xff] %v2236_v39 }
  0x66 PF: > { %p1625_p3 = scmp.ge.s32.totalorder %s2441_s16, %s2426_s15 }
  0x67   : > { %s411_s3 = ssub.s32 (!%p1625_p3), %s2426_s15, %s2441_s16 }
  0x68   : > { %410 = sbr.rel (%p1625_p3) target bundleno = 575 (0x23f), region = 81  ;;  %s412_s24 = scvt.s32.f32 (!%p1625_p3), %s411_s3 }
  0x6a   : > { %s413_s26 = smul.f32 (!%p1625_p3), 128.0, %s412_s24 }
  0x6c   : > { %s1626_s0 = sadd.f32 (!%p1625_p3), -127.0, %s413_s26 }
  0x6d   : > { %v2496_v40 = vld [vmem:[%s2482_s9 + $0x38] sm:$0xff]   ;;  %v2499_v41 = vld [vmem:[%s2482_s9 + $0x30] sm:$0xff]   ;;  %v2519_v47 = vld [vmem:[%s2482_s9 + $0x28] sm:$0xff]   ;;  %vm557_vm0 = vcmask 261120  }
  0x6e   : > { %1880 = vmatprep.subr.bf16.mxu1 %v2496_v40  ;;  %s415_s17 = smul.f32 0.5, %s1626_s0  ;;  %v2530_v55 = vld [vmem:[%s2482_s9 + $0x20] sm:$0xff]  }
  0x6f   : > { %1888 = vmatpush3.bf16.msra.mxu1 %v2496_v40 }
  0x70   : > { %1881 = vmatprep.subr.bf16.mxu1 %v2499_v41  ;;  %v2504_v42 = vstv %s415_s17  ;;  %s481_s18 = sadd.f32 127.0, %s415_s17 }
  0x71   : > { %v417_v43 = vadd.f32 %v2504_v42, %v370_v22  ;;  %v418_v44 = vadd.f32 %v2504_v42, %v371_v23  ;;  %v419_v45 = vadd.f32 %v2504_v42, %v372_v24  ;;  %v420_v46 = vadd.f32 %v2504_v42, %v373_v25 }
  0x72   : > { %v482_v48 = vstv %s481_s18  ;;  %v421_v49 = vadd.f32 %v2504_v42, %v374_v26  ;;  %v422_v50 = vadd.f32 %v2504_v42, %v2824_v27  ;;  %v423_v62 = vadd.f32 %v2504_v42, %v2823_v28 }
  0x73   : > { %1889 = vmatpush3.bf16.msra.mxu1 %v2499_v41  ;;  %v483_v51 = vsub.f32 %v482_v48, %v2472_v38  ;;  %v433_v52 = vmul.f32 -0.105360515, %v417_v43  ;;  %v434_v53 = vmul.f32 -0.105360515, %v418_v44  ;;  %v435_v54 = vmul.f32 -0.105360515, %v419_v45 }
  0x74   : > { %1882 = vmatprep.subr.bf16.mxu1 %v2519_v47  ;;  %v436_v56 = vmul.f32 -0.105360515, %v420_v46  ;;  %v437_v57 = vmul.f32 -0.105360515, %v421_v49  ;;  %v438_v58 = vmul.f32 -0.105360515, %v422_v50  ;;  %v424_v0 = vadd.f32 %v2504_v42, %v377_v29 }
  0x75   : > { %v484_v59 = vmul.f32 -0.105360515, %v483_v51  ;;  %v449_v60 = vmul.f32 1.442695, %v433_v52  ;;  %v451_v61 = vmul.f32 1.442695, %v434_v53  ;;  %v425_v3 = vadd.f32 %v2504_v42, %v2822_v30 }
  0x76   : > { %v453_v63 = vmul.f32 1.442695, %v435_v54  ;;  %v455_v2 = vmul.f32 1.442695, %v436_v56  ;;  %v457_v4 = vmul.f32 1.442695, %v437_v57  ;;  %v426_v39 = vadd.f32 %v2504_v42, %v2820_v31 }
  0x77   : > { %1890 = vmatpush3.bf16.msra.mxu1 %v2519_v47  ;;  %v485_v1 = vmul.f32 1.442695, %v484_v59  ;;  %2014 = vpow2.f32 %v449_v60  ;;  %v459_v43 = vmul.f32 1.442695, %v438_v58  ;;  %v439_v44 = vmul.f32 -0.105360515, %v423_v62 }
  0x78   : > { %1883 = vmatprep.subr.bf16.mxu1 %v2530_v55  ;;  %2016 = vpow2.f32 %v451_v61  ;;  %v2548_v45 = vld [vmem:[%s2482_s9 + $0x18] sm:$0xff]   ;;  %v440_v46 = vmul.f32 -0.105360515, %v424_v0  ;;  %v441_v48 = vmul.f32 -0.105360515, %v425_v3  ;;  %v427_v51 = vadd.f32 %v2504_v42, %v2819_v32  ;;  %v2556_v52 = vld [vmem:[%s2482_s9 + $0x10] sm:$0xff]  }
  0x79   : > { %2018 = vpow2.f32 %v485_v1  ;;  %v442_v49 = vmul.f32 -0.105360515, %v426_v39  ;;  %v461_v50 = vmul.f32 1.442695, %v439_v44  ;;  %v1723_v53 = vld [vmem:[%s2485_s8 + $0x8] sm:$0xff]   ;;  %v1677_v54 = vld [vmem:[%s2477_s12] sm:$0xff]   ;;  %v428_v57 = vadd.f32 %v2504_v42, %v2821_v33 }
  0x7a   : > { %2020 = vpow2.f32 %v453_v63  ;;  %v463_v56 = vmul.f32 1.442695, %v440_v46  ;;  %v429_v58 = vadd.f32 %v2504_v42, %v2818_v34  ;;  %v465_v59 = vmul.f32 1.442695, %v441_v48  ;;  %v1709_v60 = vld [vmem:[%s2485_s8] sm:$0xff]   ;;  %v1716_v1 = vld [vmem:[%s2477_s12 + $0x8] sm:$0xff]  }
  0x7b   : > { %1891 = vmatpush3.bf16.msra.mxu1 %v2530_v55  ;;  %2022 = vpow2.f32 %v455_v2  ;;  %v467_v61 = vmul.f32 1.442695, %v442_v49  ;;  %v430_v62 = vadd.f32 %v2504_v42, %v2817_v35  ;;  %v1714_v63 = vunpack.c.l.bf16 %v1723_v53 }
  0x7c   : > { %1884 = vmatprep.subr.bf16.mxu1 %v2548_v45  ;;  %2024 = vpow2.f32 %v457_v4  ;;  %v1678_v0 = vunpack.c.l.bf16 %v1677_v54  ;;  %v443_v2 = vmul.f32 -0.105360515, %v427_v51  ;;  %v1679_v3 = vunpack.c.h.bf16 %v1677_v54  ;;  %v1717_v51 = vld [vmem:[%s2477_s12 + $0x10] sm:$0xff]  }
  0x7d   : > { %2026 = vpow2.f32 %v459_v43  ;;  %v444_v4 = vmul.f32 -0.105360515, %v428_v57  ;;  %v445_v39 = vmul.f32 -0.105360515, %v429_v58  ;;  %v1715_v43 = vunpack.c.h.bf16 %v1723_v53 }
  0x7e   : > { %2028 = vpow2.f32 %v461_v50  ;;  %v1710_v44 = vunpack.c.l.bf16 %v1709_v60  ;;  %v1711_v46 = vunpack.c.h.bf16 %v1709_v60  ;;  %v1682_v49 = vunpack.c.l.bf16 %v1716_v1 }
  0x7f   : > { %1892 = vmatpush3.bf16.msra.mxu1 %v2548_v45  ;;  %2030 = vpow2.f32 %v463_v56  ;;  %v446_v35 = vmul.f32 -0.105360515, %v430_v62  ;;  %v1683_v50 = vunpack.c.h.bf16 %v1716_v1  ;;  %v469_v54 = vmul.f32 1.442695, %v443_v2 }
  0x80   : > { %1885 = vmatprep.subr.bf16.mxu1 %v2556_v52  ;;  %2032 = vpow2.f32 %v465_v59  ;;  %v431_v56 = vadd.f32 %v2504_v42, %v2825_v36  ;;  %v471_v53 = vmul.f32 1.442695, %v444_v4  ;;  %v473_v31 = vmul.f32 1.442695, %v445_v39 }
  0x81   : > { %2034 = vpow2.f32 %v467_v61  ;;  %v432_v59 = vadd.f32 %v2504_v42, %v385_v37  ;;  %v1686_v2 = vunpack.c.l.bf16 %v1717_v51  ;;  %v1687_v30 = vunpack.c.h.bf16 %v1717_v51 }
  0x82   : > { %v475_v28 = vmul.f32 1.442695, %v446_v35  ;;  %2036 = vpow2.f32 %v469_v54  ;;  %v447_v42 = vmul.f32 -0.105360515, %v431_v56  ;;  %v1718_v35 = vld [vmem:[%s2477_s12 + $0x18] sm:$0xff]  }
  0x83   : > { %1893 = vmatpush3.bf16.msra.mxu1 %v2556_v52  ;;  %2038 = vpow2.f32 %v471_v53  ;;  %v448_v39 = vmul.f32 -0.105360515, %v432_v59 }
  0x84   : > { %v2015_v48 = vpop.eup %2014  ;;  %2040 = vpow2.f32 %v473_v31 }
  0x85   : > { %v2017_v34 = vpop.eup %2016  ;;  %v519_v32 = vmul.f32 %v2015_v48, %v1678_v0  ;;  %2042 = vpow2.f32 %v475_v28  ;;  %v479_v53 = vmul.f32 1.442695, %v448_v39 }
  0x86   : > { %v2019_v57 = vpop.eup %2018  ;;  %v520_v58 = vmul.f32 %v2017_v34, %v1679_v3 }
  0x87   : > { %v2021_v60 = vpop.eup %2020  ;;  %v553_v61 = vmul.f32 %v2019_v57, %v1714_v63  ;;  %v554_v62 = vmul.f32 %v2019_v57, %v1715_v43  ;;  %v551_v33 = vmul.f32 %v2019_v57, %v1710_v44  ;;  %v552_v0 = vmul.f32 %v2019_v57, %v1711_v46  ;;  %v1719_v44 = vld [vmem:[%s2477_s12 + $0x20] sm:$0xff]  }
  0x88   : > { %v2023_v1 = vpop.eup %2022  ;;  %v535_v48 = vpack.c.bf16 %v520_v58, %v519_v32  ;;  %v521_v63 = vmul.f32 %v2021_v60, %v1682_v49  ;;  %v477_v46 = vmul.f32 1.442695, %v447_v42  ;;  %v1690_v57 = vunpack.c.l.bf16 %v1718_v35  ;;  %v1720_v60 = vld [vmem:[%s2477_s12 + $0x28] sm:$0xff]  }
  0x89   : > { %v2025_v27 = vpop.eup %2024  ;;  %v556_v36 = vpack.c.bf16 %v554_v62, %v553_v61  ;;  %v555_v34 = vpack.c.bf16 %v552_v0, %v551_v33  ;;  %v522_v4 = vmul.f32 %v2023_v1, %v1683_v50  ;;  %v1691_v58 = vunpack.c.h.bf16 %v1718_v35  ;;  %v1721_v61 = vld [vmem:[%s2477_s12 + $0x30] sm:$0xff]   ;;  %v1722_v35 = vld [vmem:[%s2477_s12 + $0x38] sm:$0xff]  }
  0x8a   : > { %v2027_v3 = vpop.eup %2026  ;;  %1780 = vmatprep.mubr.msk.bf16.mxu0 %vm557_vm0, %v535_v48  ;;  %v523_v32 = vmul.f32 %v2025_v27, %v1686_v2  ;;  %v1694_v49 = vunpack.c.l.bf16 %v1719_v44  ;;  %2044 = vpow2.f32 %v477_v46  ;;  %v1698_v48 = vunpack.c.l.bf16 %v1720_v60 }
  0x8b   : > { %1776 = vmatprep.subr.bf16.mxu0 %v556_v36  ;;  %v524_v43 = vmul.f32 %v2027_v3, %v1687_v30  ;;  %v2029_v33 = vpop.eup %2028  ;;  %v536_v54 = vpack.c.bf16 %v522_v4, %v521_v63  ;;  %2046 = vpow2.f32 %v479_v53  ;;  %v1699_v2 = vunpack.c.h.bf16 %v1720_v60  ;;  %v2012_v53 = vld [vmem:[%s2482_s9 + $0x8] sm:$0xff]  }
  0x8c   : > { %1777 = vmatpush3.bf16.msra.mxu0 %v556_v36  ;;  %v2031_v51 = vpop.eup %2030  ;;  %v1695_v36 = vunpack.c.h.bf16 %v1719_v44  ;;  %v525_v28 = vmul.f32 %v2029_v33, %v1690_v57  ;;  %v1702_v42 = vunpack.c.l.bf16 %v1721_v61  ;;  %v1703_v63 = vunpack.c.h.bf16 %v1721_v61  ;;  %1886 = vmatprep.subr.bf16.mxu1 %v2012_v53 }
  0x8d   : > { %1778 = vmatprep.subr.bf16.mxu0 %v555_v34  ;;  %v2033_v56 = vpop.eup %2032  ;;  %v537_v31 = vpack.c.bf16 %v524_v43, %v523_v32  ;;  %v526_v30 = vmul.f32 %v2031_v51, %v1691_v58  ;;  %v1707_v46 = vunpack.c.h.bf16 %v1722_v35  ;;  %1894 = vmatpush3.bf16.msra.mxu1 %v2012_v53 }
  0x8e   : > { %v2035_v27 = vpop.eup %2034  ;;  %v527_v50 = vmul.f32 %v2033_v56, %v1694_v49 }
  0x8f   : > { %v528_v59 = vmul.f32 %v2035_v27, %v1695_v36  ;;  %v2037_v62 = vpop.eup %2036  ;;  %v538_v1 = vpack.c.bf16 %v526_v30, %v525_v28 }
  0x90   : > { %1779 = vmatpush3.bf16.msra.mxu0 %v555_v34  ;;  %v2039_v0 = vpop.eup %2038 }
  0x91   : > { %1796 = vmatprep.subr.bf16.mxu0 %v2496_v40  ;;  %v2041_v34 = vpop.eup %2040  ;;  %v539_v3 = vpack.c.bf16 %v528_v59, %v527_v50  ;;  %v530_v39 = vmul.f32 %v2039_v0, %v1699_v2 }
  0x92   : > { %v2043_v4 = vpop.eup %2042  ;;  %v531_v32 = vmul.f32 %v2041_v34, %v1702_v42 }
  0x93   : > { %1781 = vmatmul.mubr.msk.bf16.vlgmr.msra.gmra.mxu0 %vm557_vm0, %v536_v54  ;;  %v532_v43 = vmul.f32 %v2043_v4, %v1703_v63 }
  0x94   : > { %1784 = vmatprep.mubr.msk.bf16.mxu0 %vm557_vm0, %v537_v31  ;;  %1797 = vmatpush3.bf16.msra.mxu0 %v2496_v40  ;;  %v529_v40 = vmul.f32 %v2037_v62, %v1698_v48 }
  0x95   : > { %1798 = vmatprep.subr.bf16.mxu0 %v2499_v41  ;;  %v541_v54 = vpack.c.bf16 %v532_v43, %v531_v32  ;;  %v679_v43 = vld [vmem:[#allocation2 + $0x30] sm:$0xff] }
  0x96   : > { %v540_v33 = vpack.c.bf16 %v530_v39, %v529_v40  ;;  %v681_v39 = vld [vmem:[#allocation2 + $0x58] sm:$0xff] }
  0x97   : > { %v2045_v44 = vpop.eup %2044 }
  0x98   : > { %1799 = vmatpush3.bf16.msra.mxu0 %v2499_v41  ;;  %v1706_v41 = vunpack.c.l.bf16 %v1722_v35  ;;  %v2047_v51 = vpop.eup %2046 }
  0x99   : > { %1800 = vmatprep.subr.bf16.mxu0 %v2519_v47  ;;  %v534_v58 = vmul.f32 %v2047_v51, %v1707_v46  ;;  %v680_v51 = vld [vmem:[#allocation2] sm:$0xff] }
  0x9a   : > { %v533_v57 = vmul.f32 %v2045_v44, %v1706_v41 }
  0x9b   : > { %1785 = vmatmul.mubr.msk.bf16.gmra.mxu0 %vm557_vm0, %v538_v1 }
  0x9c   : > { %1788 = vmatprep.mubr.msk.bf16.mxu0 %vm557_vm0, %v539_v3  ;;  %1801 = vmatpush3.bf16.msra.mxu0 %v2519_v47  ;;  %v542_v47 = vpack.c.bf16 %v534_v58, %v533_v57  ;;  %v685_v58 = vld [vmem:[#allocation2 + $0x8] sm:$0xff] }
  0x9d   : > { %1802 = vmatprep.subr.bf16.mxu0 %v2530_v55 }
  0xa0   : > { %1803 = vmatpush3.bf16.msra.mxu0 %v2530_v55  ;;  %v2013_v55 = vld [vmem:[%s2482_s9] sm:$0xff]  }
  0xa1   : > { %1804 = vmatprep.subr.bf16.mxu0 %v2548_v45  ;;  %1887 = vmatprep.subr.bf16.mxu1 %v2013_v55 }
  0xa2   : > { %1895 = vmatpush3.bf16.msra.mxu1 %v2013_v55 }
  0xa3   : > { %1789 = vmatmul.mubr.msk.bf16.gmra.mxu0 %vm557_vm0, %v540_v33  ;;  %v682_v33 = vld [vmem:[#allocation2 + $0x18] sm:$0xff] }
  0xa4   : > { %1792 = vmatprep.mubr.msk.bf16.mxu0 %vm557_vm0, %v541_v54  ;;  %1805 = vmatpush3.bf16.msra.mxu0 %v2548_v45 }
  0xa5   : > { %1806 = vmatprep.subr.bf16.mxu0 %v2556_v52 }
  0xa8   : > { %1807 = vmatpush3.bf16.msra.mxu0 %v2556_v52 }
  0xa9   : > { %1808 = vmatprep.subr.bf16.mxu0 %v2012_v53 }
  0xab   : > { %1793 = vmatmul.mubr.msk.bf16.gmra.mxu0 %vm557_vm0, %v542_v47 }
  0xac   : > { %1809 = vmatpush3.bf16.msra.mxu0 %v2012_v53 }
  0xad   : > { %1810 = vmatprep.subr.bf16.mxu0 %v2013_v55 }
  0xb0   : > { %1811 = vmatpush3.bf16.msra.mxu0 %v2013_v55  ;;  %v683_v55 = vld [vmem:[#allocation2 + $0x50] sm:$0xff] }
 0x153   : > { %v1782_v56 = vpop.f32.mrf.mxu0 }
 0x155   : > { %v616_v31 = vpop.f32.mrf.mxu0 }
 0x157   : > { %v1783_v45 = vpop.f32.mrf.mxu0 }
 0x158   : > { %v696_v27 = vpack.c.bf16 %v1783_v45, %v1782_v56  ;;  %v686_v45 = vld [vmem:[#allocation2 + $0x48] sm:$0xff] }
 0x159   : > { %v619_v49 = vpop.f32.mrf.mxu0 }
 0x15a   : > { %v695_v36 = vpack.c.bf16 %v619_v49, %v616_v31 }
 0x15b   : > { %v1786_v28 = vpop.f32.mrf.mxu0 }
 0x15c   : > { %1812 = vmatprep.mubr.bf16.mxu0 %v695_v36 }
 0x15d   : > { %v632_v52 = vpop.f32.mrf.mxu0  ;;  %1813 = vmatmul.mubr.bf16.vlgmr.msra.gmra.mxu0 %v696_v27  ;;  %v684_v27 = vld [vmem:[#allocation2 + $0x68] sm:$0xff] }
 0x15f   : > { %v1787_v30 = vpop.f32.mrf.mxu0 }
 0x160   : > { %v698_v60 = vpack.c.bf16 %v1787_v30, %v1786_v28  ;;  %v689_v30 = vld [vmem:[#allocation2 + $0x10] sm:$0xff] }
 0x161   : > { %v635_v50 = vpop.f32.mrf.mxu0 }
 0x162   : > { %v697_v59 = vpack.c.bf16 %v635_v50, %v632_v52 }
 0x163   : > { %v1790_v61 = vpop.f32.mrf.mxu0 }
 0x164   : > { %1816 = vmatprep.mubr.bf16.mxu1 %v697_v59 }
 0x165   : > { %v648_v62 = vpop.f32.mrf.mxu0  ;;  %1817 = vmatmul.mubr.bf16.vlgmr.msra.gmra.mxu1 %v698_v60  ;;  %v687_v60 = vld [vmem:[#allocation2 + $0x40] sm:$0xff] }
 0x167   : > { %v1791_v0 = vpop.f32.mrf.mxu0 }
 0x168   : > { %v700_v2 = vpack.c.bf16 %v1791_v0, %v1790_v61  ;;  %v690_v0 = vld [vmem:[#allocation2 + $0x38] sm:$0xff] }
 0x169   : > { %v651_v1 = vpop.f32.mrf.mxu0 }
 0x16a   : > { %v699_v48 = vpack.c.bf16 %v651_v1, %v648_v62 }
 0x16b   : > { %v1794_v34 = vpop.f32.mrf.mxu0 }
 0x16c   : > { %1820 = vmatprep.mubr.bf16.mxu1 %v699_v48 }
 0x16d   : > { %v664_v3 = vpop.f32.mrf.mxu0  ;;  %1821 = vmatmul.mubr.bf16.gmra.mxu1 %v700_v2  ;;  %v688_v2 = vld [vmem:[#allocation2 + $0x20] sm:$0xff] }
 0x16f   : > { %v1795_v42 = vpop.f32.mrf.mxu0 }
 0x170   : > { %v702_v40 = vpack.c.bf16 %v1795_v42, %v1794_v34  ;;  %v693_v42 = vld [vmem:[#allocation2 + $0x78] sm:$0xff] }
 0x171   : > { %v667_v63 = vpop.f32.mrf.mxu0 }
 0x172   : > { %v701_v4 = vpack.c.bf16 %v667_v63, %v664_v3 }
 0x174   : > { %1824 = vmatprep.mubr.bf16.mxu1 %v701_v4 }
 0x175   : > { %1825 = vmatmul.mubr.bf16.gmra.mxu1 %v702_v40  ;;  %v691_v40 = vld [vmem:[#allocation2 + $0x60] sm:$0xff] }
 0x21d   : > { %v1814_v32 = vpop.f32.mrf.mxu0 }
 0x21e   : > { %v866_v35 = vadd.f32 %v1814_v32, %v681_v39 }
 0x21f   : > { %v801_v44 = vpop.f32.mrf.mxu0 }
 0x220   : > { %882 = vst [vmem:[#allocation2 + $0x58] sm:$0xff] %v866_v35  ;;  %v864_v41 = vadd.f32 %v801_v44, %v679_v43  ;;  %v694_v43 = vld [vmem:[#allocation2 + $0x28] sm:$0xff] }
 0x221   : > { %v1815_v46 = vpop.f32.mrf.mxu0 }
 0x222   : > { %880 = vst [vmem:[#allocation2 + $0x30] sm:$0xff] %v864_v41  ;;  %v867_v54 = vadd.f32 %v1815_v46, %v682_v33  ;;  %v692_v33 = vld [vmem:[#allocation2 + $0x70] sm:$0xff] }
 0x223   : > { %v804_v57 = vpop.f32.mrf.mxu0 }
 0x224   : > { %883 = vst [vmem:[#allocation2 + $0x18] sm:$0xff] %v867_v54  ;;  %v865_v47 = vadd.f32 %v804_v57, %v680_v51 }
 0x225   : > { %v1818_v53 = vpop.f32.mrf.mxu1 }
 0x226   : > { %881 = vst [vmem:[#allocation2] sm:$0xff] %v865_v47  ;;  %v870_v56 = vadd.f32 %v1818_v53, %v685_v58 }
 0x227   : > { %v817_v31 = vpop.f32.mrf.mxu1 }
 0x228   : > { %886 = vst [vmem:[#allocation2 + $0x8] sm:$0xff] %v870_v56  ;;  %v868_v49 = vadd.f32 %v817_v31, %v683_v55 }
 0x229   : > { %v1819_v36 = vpop.f32.mrf.mxu1 }
 0x22a   : > { %884 = vst [vmem:[#allocation2 + $0x50] sm:$0xff] %v868_v49  ;;  %v871_v28 = vadd.f32 %v1819_v36, %v686_v45 }
 0x22b   : > { %v820_v52 = vpop.f32.mrf.mxu1 }
 0x22c   : > { %887 = vst [vmem:[#allocation2 + $0x48] sm:$0xff] %v871_v28  ;;  %v869_v50 = vadd.f32 %v820_v52, %v684_v27 }
 0x22d   : > { %v1822_v59 = vpop.f32.mrf.mxu1 }
 0x22e   : > { %885 = vst [vmem:[#allocation2 + $0x68] sm:$0xff] %v869_v50  ;;  %v874_v61 = vadd.f32 %v1822_v59, %v689_v30 }
 0x22f   : > { %v833_v62 = vpop.f32.mrf.mxu1 }
 0x230   : > { %890 = vst [vmem:[#allocation2 + $0x10] sm:$0xff] %v874_v61  ;;  %v872_v1 = vadd.f32 %v833_v62, %v687_v60 }
 0x231   : > { %v1823_v48 = vpop.f32.mrf.mxu1 }
 0x232   : > { %888 = vst [vmem:[#allocation2 + $0x40] sm:$0xff] %v872_v1  ;;  %v875_v34 = vadd.f32 %v1823_v48, %v690_v0 }
 0x233   : > { %v836_v3 = vpop.f32.mrf.mxu1 }
 0x234   : > { %891 = vst [vmem:[#allocation2 + $0x38] sm:$0xff] %v875_v34  ;;  %v873_v63 = vadd.f32 %v836_v3, %v688_v2 }
 0x235   : > { %v1826_v4 = vpop.f32.mrf.mxu1 }
 0x236   : > { %889 = vst [vmem:[#allocation2 + $0x20] sm:$0xff] %v873_v63  ;;  %v878_v39 = vadd.f32 %v1826_v4, %v693_v42 }
 0x237   : > { %v849_v32 = vpop.f32.mrf.mxu1 }
 0x238   : > { %894 = vst [vmem:[#allocation2 + $0x78] sm:$0xff] %v878_v39  ;;  %v876_v35 = vadd.f32 %v849_v32, %v691_v40 }
 0x239   : > { %v1827_v44 = vpop.f32.mrf.mxu1 }
 0x23a   : > { %892 = vst [vmem:[#allocation2 + $0x60] sm:$0xff] %v876_v35  ;;  %v879_v41 = vadd.f32 %v1827_v44, %v694_v43 }
 0x23b   : > { %v852_v46 = vpop.f32.mrf.mxu1 }
 0x23c   : > { %895 = vst [vmem:[#allocation2 + $0x28] sm:$0xff] %v879_v41  ;;  %v877_v51 = vadd.f32 %v852_v46, %v692_v33 }
 0x23e   : > { %893 = vst [vmem:[#allocation2 + $0x70] sm:$0xff] %v877_v51 }
 0x23f PF: > { %p1643_p5 = scmp.ne.s32.totalorder %s2441_s16, %s2426_s15 }
 0x241   : > { %899 = sbr.rel (%p1643_p5) target bundleno = 1021 (0x3fd), region = 85 }
 0x246   : > { %v2048_v54 = vld [vmem:[%s2485_s8 + $0x8] sm:$0xff]   ;;  %v2049_v57 = vld [vmem:[%s2485_s8] sm:$0xff]   ;;  %vm972_vm1 = vcmask 261120   ;;  %v1094_v61 = vsub.f32 %v370_v22, %v2472_v38  ;;  %v1097_v62 = vsub.f32 %v373_v25, %v2472_v38  ;;  %v1095_v0 = vsub.f32 %v371_v23, %v2472_v38 }
 0x247   : > { %1828 = vmatprep.subr.bf16.mxu0 %v2048_v54  ;;  %v2050_v58 = vld [vmem:[%s2477_s12] sm:$0xff]   ;;  %v2051_v47 = vld [vmem:[%s2477_s12 + $0x8] sm:$0xff]   ;;  %v2052_v53 = vld [vmem:[%s2477_s12 + $0x10] sm:$0xff]   ;;  %v1096_v1 = vsub.f32 %v372_v24, %v2472_v38  ;;  %v1098_v22 = vsub.f32 %v374_v26, %v2472_v38  ;;  %v1101_v25 = vsub.f32 %v377_v29, %v2472_v38  ;;  %v2837_v23 = vcvt.s32.f32 %v2414_v11 }
 0x248   : > { %1829 = vmatpush3.bf16.msra.mxu0 %v2048_v54  ;;  %1832 = vmatprep.mubr.msk.bf16.mxu0 %vm972_vm1, %v2050_v58  ;;  %v2058_v55 = vld [vmem:[%s2482_s9 + $0x38] sm:$0xff]   ;;  %v2059_v56 = vld [vmem:[%s2482_s9 + $0x30] sm:$0xff]   ;;  %v2054_v45 = vld [vmem:[%s2477_s12 + $0x20] sm:$0xff]   ;;  %v1110_v48 = vmul.f32 -0.105360515, %v1094_v61  ;;  %v2838_v39 = vcvt.s32.f32 %v2417_v12  ;;  %v2839_v54 = vcvt.s32.f32 %v2423_v14  ;;  %vm1145_vm2 = vcmp.ge.s32.totalorder %v2405_v9, %v2393_v6 }
 0x249   : > { %1830 = vmatprep.subr.bf16.mxu0 %v2049_v57  ;;  %v2053_v31 = vld [vmem:[%s2477_s12 + $0x18] sm:$0xff]   ;;  %1896 = vmatprep.subr.bf16.mxu1 %v2058_v55  ;;  %v2060_v49 = vld [vmem:[%s2482_s9 + $0x28] sm:$0xff]   ;;  %v2061_v36 = vld [vmem:[%s2482_s9 + $0x20] sm:$0xff]   ;;  %v1113_v2 = vmul.f32 -0.105360515, %v1097_v62  ;;  %v1099_v40 = vsub.f32 %v2837_v23, %v2472_v38  ;;  %vm1142_vm3 = vcmp.ge.s32.totalorder %v2387_v5, %v2393_v6  ;;  %vm1143_vm4 = vcmp.ge.s32.totalorder %v2399_v7, %v2393_v6 }
 0x24a   : > { %1904 = vmatpush3.bf16.msra.mxu1 %v2058_v55  ;;  %v2055_v27 = vld [vmem:[%s2477_s12 + $0x28] sm:$0xff]   ;;  %v2062_v28 = vld [vmem:[%s2482_s9 + $0x18] sm:$0xff]   ;;  %v2056_v52 = vld [vmem:[%s2477_s12 + $0x30] sm:$0xff]   ;;  %v1111_v34 = vmul.f32 -0.105360515, %v1095_v0  ;;  %v1126_v42 = vmin.f32 %v1110_v48, 0.0  ;;  %v1100_v32 = vsub.f32 %v2838_v39, %v2472_v38  ;;  %v2843_v0 = vcvt.s32.f32 %v2438_v18 }
 0x24b   : > { %1897 = vmatprep.subr.bf16.mxu1 %v2059_v56  ;;  %v2057_v30 = vld [vmem:[%s2477_s12 + $0x38] sm:$0xff]   ;;  %v2063_v50 = vld [vmem:[%s2482_s9 + $0x10] sm:$0xff]   ;;  %v2064_v59 = vld [vmem:[%s2482_s9 + $0x8] sm:$0xff]   ;;  %v1112_v3 = vmul.f32 -0.105360515, %v1096_v1  ;;  %v1129_v63 = vmin.f32 %v1113_v2, 0.0  ;;  %v1109_v2 = vsub.f32 %v385_v37, %v2472_v38  ;;  %vm1144_vm5 = vcmp.ge.s32.totalorder %v2402_v8, %v2393_v6 }
 0x24c   : > { %1831 = vmatpush3.bf16.msra.mxu0 %v2049_v57  ;;  %v2065_v60 = vld [vmem:[%s2482_s9] sm:$0xff]   ;;  %v1127_v4 = vmin.f32 %v1111_v34, 0.0  ;;  %v1158_v43 = vmul.f32 1.442695, %v1126_v42  ;;  %v1114_v35 = vmul.f32 -0.105360515, %v1098_v22  ;;  %v1102_v57 = vsub.f32 %v2839_v54, %v2472_v38 }
 0x24d   : > { %1848 = vmatprep.subr.bf16.mxu0 %v2058_v55  ;;  %v1128_v24 = vmin.f32 %v1112_v3, 0.0  ;;  %v1164_v44 = vmul.f32 1.442695, %v1129_v63  ;;  %v1117_v33 = vmul.f32 -0.105360515, %v1101_v25  ;;  %v1106_v1 = vsub.f32 %v2843_v0, %v2472_v38 }
 0x24e   : > { %1905 = vmatpush3.bf16.msra.mxu1 %v2059_v56  ;;  %v1160_v26 = vmul.f32 1.442695, %v1127_v4  ;;  %v1115_v41 = vmul.f32 -0.105360515, %v1099_v40  ;;  %v1116_v51 = vmul.f32 -0.105360515, %v1100_v32  ;;  %2066 = vpow2.f32 %v1158_v43 }
 0x24f   : > { %1833 = vmatmul.mubr.msk.bf16.vlgmr.msra.gmra.mxu0 %vm972_vm1, %v2051_v47  ;;  %1898 = vmatprep.subr.bf16.mxu1 %v2060_v49  ;;  %v1162_v46 = vmul.f32 1.442695, %v1128_v24  ;;  %v1130_v29 = vmin.f32 %v1114_v35, 0.0  ;;  %2068 = vpow2.f32 %v1164_v44  ;;  %v1133_v58 = vmin.f32 %v1117_v33, 0.0 }
 0x250   : > { %1836 = vmatprep.mubr.msk.bf16.mxu0 %vm972_vm1, %v2052_v53  ;;  %1849 = vmatpush3.bf16.msra.mxu0 %v2058_v55  ;;  %v2840_v47 = vcvt.s32.f32 %v2435_v17  ;;  %2070 = vpow2.f32 %v1160_v26  ;;  %v1131_v55 = vmin.f32 %v1115_v41, 0.0  ;;  %v2844_v3 = vcvt.s32.f32 %v2444_v19 }
 0x251   : > { %1850 = vmatprep.subr.bf16.mxu0 %v2059_v56  ;;  %2072 = vpow2.f32 %v1162_v46  ;;  %v2845_v63 = vcvt.s32.f32 %v2447_v20  ;;  %v1122_v23 = vmul.f32 -0.105360515, %v1106_v1  ;;  %v1125_v39 = vmul.f32 -0.105360515, %v1109_v2 }
 0x252   : > { %1906 = vmatpush3.bf16.msra.mxu1 %v2060_v49  ;;  %v1105_v53 = vsub.f32 %v2840_v47, %v2472_v38  ;;  %v1107_v42 = vsub.f32 %v2844_v3, %v2472_v38  ;;  %vm1149_vm6 = vcmp.ge.s32.totalorder %v2420_v13, %v2393_v6  ;;  %vm1146_vm7 = vcmp.ge.s32.totalorder %v2408_v10, %v2393_v6 }
 0x253   : > { %1899 = vmatprep.subr.bf16.mxu1 %v2061_v36  ;;  %v1108_v25 = vsub.f32 %v2845_v63, %v2472_v38  ;;  %v1138_v46 = vmin.f32 %v1122_v23, 0.0  ;;  %v1141_v9 = vmin.f32 %v1125_v39, 0.0  ;;  %vm1147_vm8 = vcmp.ge.s32.totalorder %v2414_v11, %v2393_v6 }
 0x254   : > { %1851 = vmatpush3.bf16.msra.mxu0 %v2059_v56  ;;  %v2841_v56 = vcvt.s32.f32 %v2429_v15  ;;  %v1123_v35 = vmul.f32 -0.105360515, %v1107_v42  ;;  %vm1148_vm9 = vcmp.ge.s32.totalorder %v2417_v12, %v2393_v6  ;;  %vm1153_vm10 = vcmp.ge.s32.totalorder %v2435_v17, %v2393_v6 }
 0x255   : > { %1852 = vmatprep.subr.bf16.mxu0 %v2060_v49  ;;  %v1124_v33 = vmul.f32 -0.105360515, %v1108_v25  ;;  %vm1150_vm11 = vcmp.ge.s32.totalorder %v2423_v14, %v2393_v6  ;;  %vm1151_vm12 = vcmp.ge.s32.totalorder %v2429_v15, %v2393_v6  ;;  %vm1152_vm13 = vcmp.ge.s32.totalorder %v2432_v16, %v2393_v6 }
 0x256   : > { %1907 = vmatpush3.bf16.msra.mxu1 %v2061_v36  ;;  %v1139_v5 = vmin.f32 %v1123_v35, 0.0  ;;  %vm1157_vm14 = vcmp.ge.s32.totalorder %v2450_v21, %v2393_v6  ;;  %vm1154_vm15 = vcmp.ge.s32.totalorder %v2438_v18, %v2393_v6  ;;  %vm1155_vm0 = vcmp.ge.s32.totalorder %v2444_v19, %v2393_v6 }
 0x257   : > { %1837 = vmatmul.mubr.msk.bf16.gmra.mxu0 %vm972_vm1, %v2053_v31  ;;  %1900 = vmatprep.subr.bf16.mxu1 %v2062_v28  ;;  %v1103_v31 = vsub.f32 %v2841_v56, %v2472_v38  ;;  %v1140_v7 = vmin.f32 %v1124_v33, 0.0 }
 0x258   : > { %1840 = vmatprep.mubr.msk.bf16.mxu0 %vm972_vm1, %v2054_v45  ;;  %1853 = vmatpush3.bf16.msra.mxu0 %v2060_v49  ;;  %v1132_v45 = vmin.f32 %v1116_v51, 0.0  ;;  %v2842_v49 = vcvt.s32.f32 %v2432_v16 }
 0x259   : > { %1854 = vmatprep.subr.bf16.mxu0 %v2061_v36 }
 0x25a   : > { %1908 = vmatpush3.bf16.msra.mxu1 %v2062_v28 }
 0x25b   : > { %1901 = vmatprep.subr.bf16.mxu1 %v2063_v50  ;;  %v2067_v40 = vpop.eup %2066 }
 0x25c   : > { %1855 = vmatpush3.bf16.msra.mxu0 %v2061_v36  ;;  %v1104_v36 = vsub.f32 %v2842_v49, %v2472_v38  ;;  %v2069_v32 = vpop.eup %2068 }
 0x25d   : > { %1856 = vmatprep.subr.bf16.mxu0 %v2062_v28  ;;  %v2071_v44 = vpop.eup %2070  ;;  %v1193_v51 = vsel %vm1145_vm2, %v2069_v32, 0.0 }
 0x25e   : > { %1909 = vmatpush3.bf16.msra.mxu1 %v2063_v50  ;;  %v1120_v61 = vmul.f32 -0.105360515, %v1104_v36  ;;  %v2073_v26 = vpop.eup %2072 }
 0x25f   : > { %1841 = vmatmul.mubr.msk.bf16.gmra.mxu0 %vm972_vm1, %v2055_v27  ;;  %1902 = vmatprep.subr.bf16.mxu1 %v2064_v59  ;;  %v1166_v27 = vmul.f32 1.442695, %v1130_v29  ;;  %v1190_v29 = vsel %vm1142_vm3, %v2067_v40, 0.0 }
 0x260   : > { %1844 = vmatprep.mubr.msk.bf16.mxu0 %vm972_vm1, %v2056_v52  ;;  %1857 = vmatpush3.bf16.msra.mxu0 %v2062_v28  ;;  %v1118_v28 = vmul.f32 -0.105360515, %v1102_v57  ;;  %v1172_v52 = vmul.f32 1.442695, %v1133_v58  ;;  %v1136_v22 = vmin.f32 %v1120_v61, 0.0  ;;  %v1191_v57 = vsel %vm1143_vm4, %v2071_v44, 0.0 }
 0x261   : > { %1858 = vmatprep.subr.bf16.mxu0 %v2063_v50  ;;  %2074 = vpow2.f32 %v1166_v27  ;;  %v1192_v58 = vsel %vm1144_vm5, %v2073_v26, 0.0 }
 0x262   : > { %1910 = vmatpush3.bf16.msra.mxu1 %v2064_v59  ;;  %v1134_v62 = vmin.f32 %v1118_v28, 0.0  ;;  %2076 = vpow2.f32 %v1172_v52  ;;  %v1178_v38 = vmul.f32 1.442695, %v1136_v22  ;;  %v1184_v28 = vmul.f32 1.442695, %v1139_v5 }
 0x263   : > { %1903 = vmatprep.subr.bf16.mxu1 %v2065_v60 }
 0x264   : > { %1859 = vmatpush3.bf16.msra.mxu0 %v2063_v50  ;;  %v1168_v50 = vmul.f32 1.442695, %v1131_v55  ;;  %v1174_v4 = vmul.f32 1.442695, %v1134_v62  ;;  %v1182_v55 = vmul.f32 1.442695, %v1138_v46 }
 0x265   : > { %1860 = vmatprep.subr.bf16.mxu0 %v2064_v59 }
 0x266   : > { %1911 = vmatpush3.bf16.msra.mxu1 %v2065_v60  ;;  %2078 = vpow2.f32 %v1168_v50  ;;  %v1186_v50 = vmul.f32 1.442695, %v1140_v7 }
 0x267   : > { %1845 = vmatmul.mubr.msk.bf16.gmra.mxu0 %vm972_vm1, %v2057_v30  ;;  %v1121_v30 = vmul.f32 -0.105360515, %v1105_v53  ;;  %vm1156_vm1 = vcmp.ge.s32.totalorder %v2447_v20, %v2393_v6  ;;  %v1208_v6 = vld [vmem:[#allocation2 + $0x58] sm:$0xff] }
 0x268   : > { %1861 = vmatpush3.bf16.msra.mxu0 %v2064_v59  ;;  %v1119_v59 = vmul.f32 -0.105360515, %v1103_v31 }
 0x269   : > { %1862 = vmatprep.subr.bf16.mxu0 %v2065_v60  ;;  %v1137_v48 = vmin.f32 %v1121_v30, 0.0 }
 0x26a   : > { %v1135_v34 = vmin.f32 %v1119_v59, 0.0 }
 0x26b   : > { %v1180_v24 = vmul.f32 1.442695, %v1137_v48 }
 0x26c   : > { %1863 = vmatpush3.bf16.msra.mxu0 %v2065_v60  ;;  %v1170_v60 = vmul.f32 1.442695, %v1132_v45  ;;  %v1176_v37 = vmul.f32 1.442695, %v1135_v34  ;;  %v1188_v45 = vmul.f32 1.442695, %v1141_v9 }
 0x26e   : > { %2080 = vpow2.f32 %v1170_v60  ;;  %v2075_v56 = vpop.eup %2074 }
 0x26f   : > { %2082 = vpow2.f32 %v1174_v4  ;;  %v2077_v49 = vpop.eup %2076  ;;  %v1194_v13 = vsel %vm1146_vm7, %v2075_v56, 0.0  ;;  %v1206_v56 = vld [vmem:[#allocation2 + $0x30] sm:$0xff] }
 0x270   : > { %2084 = vpow2.f32 %v1180_v24  ;;  %v1197_v62 = vsel %vm1149_vm6, %v2077_v49, 0.0 }
 0x271   : > { %2086 = vpow2.f32 %v1176_v37 }
 0x272   : > { %2088 = vpow2.f32 %v1178_v38 }
 0x273   : > { %v2079_v52 = vpop.eup %2078  ;;  %2090 = vpow2.f32 %v1182_v55 }
 0x274   : > { %2092 = vpow2.f32 %v1188_v45  ;;  %v1195_v1 = vsel %vm1147_vm8, %v2079_v52, 0.0  ;;  %v1209_v45 = vld [vmem:[#allocation2 + $0x18] sm:$0xff] }
 0x275   : > { %2094 = vpow2.f32 %v1184_v28 }
 0x276   : > { %2096 = vpow2.f32 %v1186_v50 }
 0x27b   : > { %v2081_v59 = vpop.eup %2080 }
 0x27c   : > { %v1196_v10 = vsel %vm1148_vm9, %v2081_v59, 0.0  ;;  %v2083_v2 = vpop.eup %2082 }
 0x27d   : > { %v2085_v42 = vpop.eup %2084  ;;  %v1198_v39 = vsel %vm1150_vm11, %v2083_v2, 0.0  ;;  %v1216_v2 = vld [vmem:[#allocation2 + $0x10] sm:$0xff] }
 0x27e   : > { %v2087_v63 = vpop.eup %2086  ;;  %v1201_v24 = vsel %vm1153_vm10, %v2085_v42, 0.0  ;;  %v1214_v42 = vld [vmem:[#allocation2 + $0x40] sm:$0xff] }
 0x27f   : > { %v2089_v4 = vpop.eup %2088  ;;  %v1199_v17 = vsel %vm1151_vm12, %v2087_v63, 0.0  ;;  %v1217_v63 = vld [vmem:[#allocation2 + $0x38] sm:$0xff] }
 0x280   : > { %v2091_v14 = vpop.eup %2090 }
 0x281   : > { %v2093_v33 = vpop.eup %2092 }
 0x282   : > { %v2095_v16 = vpop.eup %2094 }
 0x283   : > { %v2097_v46 = vpop.eup %2096  ;;  %v1203_v21 = vsel %vm1155_vm0, %v2095_v16, 0.0 }
 0x284   : > { %v1204_v5 = vsel %vm1156_vm1, %v2097_v46, 0.0 }
 0x30f   : > { %v1834_v43 = vpop.f32.mrf.mxu0 }
 0x310   : > { %v1224_v36 = vmul.f32 %v1834_v43, %v1192_v58  ;;  %v1200_v43 = vsel %vm1152_vm13, %v2089_v4, 0.0 }
 0x311   : > { %v1031_v41 = vpop.f32.mrf.mxu0 }
 0x312   : > { %v1222_v31 = vmul.f32 %v1190_v29, %v1031_v41  ;;  %v1205_v29 = vsel %vm1157_vm14, %v2093_v33, 0.0  ;;  %v1219_v33 = vld [vmem:[#allocation2 + $0x70] sm:$0xff] }
 0x313   : > { %v1835_v54 = vpop.f32.mrf.mxu0 }
 0x314   : > { %v1225_v47 = vmul.f32 %v1835_v54, %v1193_v51  ;;  %v1202_v54 = vsel %vm1154_vm15, %v2091_v14, 0.0  ;;  %v1221_v14 = vld [vmem:[#allocation2 + $0x28] sm:$0xff] }
 0x315   : > { %v1034_v53 = vpop.f32.mrf.mxu0 }
 0x316   : > { %v1223_v8 = vmul.f32 %v1191_v57, %v1034_v53  ;;  %v1239_v60 = vpack.c.bf16 %v1225_v47, %v1224_v36 }
 0x317   : > { %v1838_v27 = vpop.f32.mrf.mxu0 }
 0x318   : > { %v1238_v30 = vpack.c.bf16 %v1223_v8, %v1222_v31  ;;  %v1228_v22 = vmul.f32 %v1838_v27, %v1196_v10  ;;  %v1207_v27 = vld [vmem:[#allocation2] sm:$0xff]  ;;  %v1211_v10 = vld [vmem:[#allocation2 + $0x68] sm:$0xff] }
 0x319   : > { %v1047_v61 = vpop.f32.mrf.mxu0 }
 0x31a   : > { %1864 = vmatprep.mubr.bf16.mxu0 %v1238_v30  ;;  %v1226_v34 = vmul.f32 %v1194_v13, %v1047_v61  ;;  %v1212_v30 = vld [vmem:[#allocation2 + $0x8] sm:$0xff] }
 0x31b   : > { %v1839_v0 = vpop.f32.mrf.mxu0  ;;  %1865 = vmatmul.mubr.bf16.vlgmr.msra.gmra.mxu0 %v1239_v60  ;;  %v1210_v60 = vld [vmem:[#allocation2 + $0x50] sm:$0xff]  ;;  %v1213_v13 = vld [vmem:[#allocation2 + $0x48] sm:$0xff] }
 0x31c   : > { %v1229_v48 = vmul.f32 %v1839_v0, %v1197_v62 }
 0x31d   : > { %v1050_v11 = vpop.f32.mrf.mxu0 }
 0x31e   : > { %v1227_v3 = vmul.f32 %v1195_v1, %v1050_v11  ;;  %v1241_v23 = vpack.c.bf16 %v1229_v48, %v1228_v22 }
 0x31f   : > { %v1842_v12 = vpop.f32.mrf.mxu0 }
 0x320   : > { %v1240_v25 = vpack.c.bf16 %v1227_v3, %v1226_v34  ;;  %v1232_v15 = vmul.f32 %v1842_v12, %v1200_v43  ;;  %v1218_v43 = vld [vmem:[#allocation2 + $0x60] sm:$0xff] }
 0x321   : > { %v1063_v40 = vpop.f32.mrf.mxu0 }
 0x322   : > { %1868 = vmatprep.mubr.bf16.mxu1 %v1240_v25  ;;  %v1230_v44 = vmul.f32 %v1198_v39, %v1063_v40  ;;  %v1220_v39 = vld [vmem:[#allocation2 + $0x78] sm:$0xff] }
 0x323   : > { %v1843_v32 = vpop.f32.mrf.mxu0  ;;  %1869 = vmatmul.mubr.bf16.vlgmr.msra.gmra.mxu1 %v1241_v23  ;;  %v1215_v23 = vld [vmem:[#allocation2 + $0x20] sm:$0xff] }
 0x324   : > { %v1233_v37 = vmul.f32 %v1843_v32, %v1201_v24 }
 0x325   : > { %v1066_v35 = vpop.f32.mrf.mxu0 }
 0x326   : > { %v1231_v38 = vmul.f32 %v1199_v17, %v1066_v35  ;;  %v1243_v51 = vpack.c.bf16 %v1233_v37, %v1232_v15 }
 0x327   : > { %v1846_v26 = vpop.f32.mrf.mxu0 }
 0x328   : > { %v1242_v41 = vpack.c.bf16 %v1231_v38, %v1230_v44  ;;  %v1236_v53 = vmul.f32 %v1846_v26, %v1204_v5 }
 0x329   : > { %v1079_v9 = vpop.f32.mrf.mxu0 }
 0x32a   : > { %1872 = vmatprep.mubr.bf16.mxu1 %v1242_v41  ;;  %v1234_v18 = vmul.f32 %v1202_v54, %v1079_v9 }
 0x32b   : > { %v1847_v57 = vpop.f32.mrf.mxu0  ;;  %1873 = vmatmul.mubr.bf16.gmra.mxu1 %v1243_v51 }
 0x32c   : > { %v1237_v58 = vmul.f32 %v1847_v57, %v1205_v29 }
 0x32d   : > { %v1082_v7 = vpop.f32.mrf.mxu0 }
 0x32e   : > { %v1235_v47 = vmul.f32 %v1203_v21, %v1082_v7  ;;  %v1245_v55 = vpack.c.bf16 %v1237_v58, %v1236_v53 }
 0x330   : > { %v1244_v19 = vpack.c.bf16 %v1235_v47, %v1234_v18 }
 0x332   : > { %1876 = vmatprep.mubr.bf16.mxu1 %v1244_v19 }
 0x333   : > { %1877 = vmatmul.mubr.bf16.gmra.mxu1 %v1245_v55 }
 0x3db   : > { %v1866_v20 = vpop.f32.mrf.mxu0 }
 0x3dc   : > { %v1409_v31 = vadd.f32 %v1866_v20, %v1208_v6 }
 0x3dd   : > { %v1344_v8 = vpop.f32.mrf.mxu0 }
 0x3de   : > { %1425 = vst [vmem:[#allocation2 + $0x58] sm:$0xff] %v1409_v31  ;;  %1457 = vst [vmem:[%s2488_s13 + $0x10] sm:$0xff] %v1409_v31  ;;  %v1407_v49 = vadd.f32 %v1344_v8, %v1206_v56 }
 0x3df   : > { %v1867_v36 = vpop.f32.mrf.mxu0 }
 0x3e0   : > { %1423 = vst [vmem:[#allocation2 + $0x30] sm:$0xff] %v1407_v49  ;;  %1455 = vst [vmem:[%s2488_s13] sm:$0xff] %v1407_v49  ;;  %v1410_v28 = vadd.f32 %v1867_v36, %v1209_v45 }
 0x3e1   : > { %v1347_v52 = vpop.f32.mrf.mxu0 }
 0x3e2   : > { %1426 = vst [vmem:[#allocation2 + $0x18] sm:$0xff] %v1410_v28  ;;  %1458 = vst [vmem:[%s2488_s13 + $0x18] sm:$0xff] %v1410_v28  ;;  %v1408_v50 = vadd.f32 %v1347_v52, %v1207_v27 }
 0x3e3   : > { %v1870_v59 = vpop.f32.mrf.mxu1 }
 0x3e4   : > { %1424 = vst [vmem:[#allocation2] sm:$0xff] %v1408_v50  ;;  %1456 = vst [vmem:[%s2488_s13 + $0x8] sm:$0xff] %v1408_v50  ;;  %v1413_v61 = vadd.f32 %v1870_v59, %v1212_v30 }
 0x3e5   : > { %v1360_v62 = vpop.f32.mrf.mxu1 }
 0x3e6   : > { %1429 = vst [vmem:[#allocation2 + $0x8] sm:$0xff] %v1413_v61  ;;  %1461 = vst [vmem:[%s2488_s13 + $0x30] sm:$0xff] %v1413_v61  ;;  %v1411_v0 = vadd.f32 %v1360_v62, %v1210_v60 }
 0x3e7   : > { %v1871_v1 = vpop.f32.mrf.mxu1 }
 0x3e8   : > { %1427 = vst [vmem:[#allocation2 + $0x50] sm:$0xff] %v1411_v0  ;;  %1459 = vst [vmem:[%s2488_s13 + $0x20] sm:$0xff] %v1411_v0  ;;  %v1414_v48 = vadd.f32 %v1871_v1, %v1213_v13 }
 0x3e9   : > { %v1363_v11 = vpop.f32.mrf.mxu1 }
 0x3ea   : > { %1430 = vst [vmem:[#allocation2 + $0x48] sm:$0xff] %v1414_v48  ;;  %1462 = vst [vmem:[%s2488_s13 + $0x38] sm:$0xff] %v1414_v48  ;;  %v1412_v34 = vadd.f32 %v1363_v11, %v1211_v10 }
 0x3eb   : > { %v1874_v3 = vpop.f32.mrf.mxu1 }
 0x3ec   : > { %1428 = vst [vmem:[#allocation2 + $0x68] sm:$0xff] %v1412_v34  ;;  %1460 = vst [vmem:[%s2488_s13 + $0x28] sm:$0xff] %v1412_v34  ;;  %v1417_v22 = vadd.f32 %v1874_v3, %v1216_v2 }
 0x3ed   : > { %v1376_v12 = vpop.f32.mrf.mxu1 }
 0x3ee   : > { %1433 = vst [vmem:[#allocation2 + $0x10] sm:$0xff] %v1417_v22  ;;  %1465 = vst [vmem:[%s2488_s13 + $0x50] sm:$0xff] %v1417_v22  ;;  %v1415_v25 = vadd.f32 %v1376_v12, %v1214_v42 }
 0x3ef   : > { %v1875_v4 = vpop.f32.mrf.mxu1 }
 0x3f0   : > { %1431 = vst [vmem:[#allocation2 + $0x40] sm:$0xff] %v1415_v25  ;;  %1463 = vst [vmem:[%s2488_s13 + $0x40] sm:$0xff] %v1415_v25  ;;  %v1418_v40 = vadd.f32 %v1875_v4, %v1217_v63 }
 0x3f1   : > { %v1379_v24 = vpop.f32.mrf.mxu1 }
 0x3f2   : > { %1434 = vst [vmem:[#allocation2 + $0x38] sm:$0xff] %v1418_v40  ;;  %1466 = vst [vmem:[%s2488_s13 + $0x58] sm:$0xff] %v1418_v40  ;;  %v1416_v32 = vadd.f32 %v1379_v24, %v1215_v23 }
 0x3f3   : > { %v1878_v17 = vpop.f32.mrf.mxu1 }
 0x3f4   : > { %1432 = vst [vmem:[#allocation2 + $0x20] sm:$0xff] %v1416_v32  ;;  %1464 = vst [vmem:[%s2488_s13 + $0x48] sm:$0xff] %v1416_v32  ;;  %v1421_v37 = vadd.f32 %v1878_v17, %v1220_v39 }
 0x3f5   : > { %v1392_v35 = vpop.f32.mrf.mxu1 }
 0x3f6   : > { %1437 = vst [vmem:[#allocation2 + $0x78] sm:$0xff] %v1421_v37  ;;  %1469 = vst [vmem:[%s2488_s13 + $0x70] sm:$0xff] %v1421_v37  ;;  %v1419_v44 = vadd.f32 %v1392_v35, %v1218_v43 }
 0x3f7   : > { %v1879_v38 = vpop.f32.mrf.mxu1 }
 0x3f8   : > { %1435 = vst [vmem:[#allocation2 + $0x60] sm:$0xff] %v1419_v44  ;;  %1467 = vst [vmem:[%s2488_s13 + $0x60] sm:$0xff] %v1419_v44  ;;  %v1422_v15 = vadd.f32 %v1879_v38, %v1221_v14 }
 0x3f9   : > { %v1395_v26 = vpop.f32.mrf.mxu1 }
 0x3fa   : > { %1438 = vst [vmem:[#allocation2 + $0x28] sm:$0xff] %v1422_v15  ;;  %1470 = vst [vmem:[%s2488_s13 + $0x78] sm:$0xff] %v1422_v15  ;;  %v1420_v16 = vadd.f32 %v1395_v26, %v1219_v33 }
 0x3fc   : > { %1436 = vst [vmem:[#allocation2 + $0x70] sm:$0xff] %v1420_v16  ;;  %1468 = vst [vmem:[%s2488_s13 + $0x68] sm:$0xff] %v1420_v16 }
 0x3fd PF: > { %s1912_s8 = scalar_select %p2354_p4, [#allocation4], [#allocation9] }
 0x3fe   : > { %s2869_s6 = smov (!%p2354_p4, %s2216_s6), 0  ;;  %s1488_s15 = sshll.u32 %s2488_s13, 4  ;;  %s2739_s15 = int_to_ptr.vmem [resolvable:$true] %s1488_s15 }
 0x3ff   : > { %s1479_s9 = sld [smem:[%s1912_s8 + %s2869_s6]]  ;;  %s1672_s16 = sshll.u32 %s2220_s7, 5 }
 0x400   : > { %s2846_s11 = sld [smem:[#allocation18_spill]]  ;;  %s2847_s29 = sand.u32 1, %s2200_s27  }
 0x401   : > { %s2748_s3 = scalar_lea.sflag [#allocation8], %s2847_s29  ;;  %s2122_s24 = scalar_lea.vmem %s2739_s15, 2048 }
 0x402   : > { %p2123_p6 = scmp.ne.s32.totalorder %s2739_s15, %s2122_s24  ;;  %s2237_s6 = smov [#allocation7]  }
 0x403   : > { %s2126_s7 = sshll.u32 %s2237_s6, 4  ;;  %s2127_s7 = int_to_ptr.vmem [resolvable:$false] %s2126_s7 }
 0x404   : > { %p2124_p7 = pnand %p2123_p6, %p2354_p4  ;;  %s2128_s13 = scalar_lea.vmem %s2127_s7, 4096 }
 0x405   : > { %s1671_s20 = sshll.u32 %s1479_s9, 4  ;;  %p2129_p10 = scmp.lt.s32.totalorder %s2739_s15, %s2127_s7 }
 0x406   : > { %s1485_s22 = sadd.s32 %s1672_s16, %s1671_s20  ;;  %p2125_p9 = pneg %p2124_p7 }
 0x407   : > { %s1673_s21 = sshll.u32 %s1485_s22, 7  ;;  %p2130_p11 = scmp.lt.s32.totalorder %s2128_s13, %s2122_s24 }
 0x408   : > { %s2744_s12 = scalar_lea.hbm %s2846_s11, %s1673_s21 }
 0x409   : > { %p2131_p12 = por %p2130_p11, %p2129_p10 }
 0x40b   : > { %p2132_p13 = pnand %p2131_p12, %p2125_p9 }
 0x40d   : > { %2135 = shalt.err (!%p2132_p13)
}
 0x40e   : > { %s2136_s26 = scalar_lea.hbm %s2744_s12, 2048  ;;  %s2140_s18 = scalar_lea.hbm %s2846_s11, 8192 }
 0x40f   : > { %p2137_p0 = scmp.ne.s32.totalorder %s2744_s12, %s2136_s26  ;;  %p2141_p3 = scmp.lt.s32.totalorder %s2744_s12, %s2846_s11 }
 0x410   : > { %p2142_p5 = scmp.lt.s32.totalorder %s2140_s18, %s2136_s26 }
 0x411   : > { %p2138_p1 = pnand %p2137_p0, %p2354_p4 }
 0x412   : > { %p2143_p6 = por %p2142_p5, %p2141_p3 }
 0x413   : > { %p2139_p2 = pneg %p2138_p1 }
 0x415   : > { %p2144_p7 = pnand %p2143_p6, %p2139_p2 }
 0x417   : > { %2147 = shalt.err (!%p2144_p7)
}
 0x418   : > { %s2238_s16 = smov 128   ;;  %s2239_s20 = smov 8  }
 0x419   : > { %1914 = dma.vmem_to_hbm [thread:$0]  (%p2354_p4), %s2739_s15, 2048, %s2744_s12, %s2748_s3, %s2238_s16, %s2238_s16, %s2239_s20  }
 0x41a PF: > { %p1920_p9 = scmp.ge.s32.totalorder %s2232_s10, 2  ;;  %s1503_s22 = sand.u32 1, %s2196_s1  }
 0x41b   : > { %s1504_s21 = scalar_lea.sflag [#allocation8], %s1503_s22 }
 0x41c   : > { %p1917_p10 = pnand %p1920_p9, %p2361_p8 }
 0x41e   : > { %p1918_p11 = pneg %p1917_p10 }
 0x420   : > { %2191 = dma.done.wait (%p1918_p11), %s1504_s21, 2048  }
 0x421   : > { %2193 = vsyncadd (%p1918_p11), %s1504_s21, 4294965248  ;;  %s28_s10 = sadd.s32 1, %s2232_s10   ;;  %s2848_s25 = sld [smem:[#allocation16_spill]] }
 0x422   : > { %p25_p12 = scmp.ge.s32.totalorder %s28_s10, 8   ;;  %s2849_s6 = sld [smem:[#allocation12_spill]] }
 0x423   : > { %s2850_s7 = sld [smem:[#allocation13_spill]]  ;;  %s2853_s1 = smov %s2200_s27 }
 0x424   : > { %s2851_s8 = sld [smem:[#allocation14_spill]]  ;;  %s2854_s27 = smov %s2204_s28 }
 0x425   : > { %s2852_s9 = sld [smem:[#allocation15_spill]]  ;;  %s2855_s28 = smov %s2366_s14 }
 0x426   : > { %s2856_s29 = smov %s2212_s30  ;;  %27 = sbr.rel (!%p25_p12) target bundleno = 32 (0x20), region = 131 }
 0x427   : > { %s2857_s30 = smov %s2848_s25 }
 0x42b   :  { %1509 = vsyncpa [#allocation8], 1 }
 0x42c   :  { %1511 = vsyncpa [#allocation8 + $0x1], 1 }

</bundles_post_ra>
